<compile_context>
chip_gen: v7x
topology: tpu7x:2x2x1
jax: 0.10.0
libtpu: 0.0.40
codegen_flags: <defaults>
</compile_context>

<pallas_src>
import functools

import jax
import jax.numpy as jnp
import numpy as np
from jax import lax
from jax.experimental import pallas as pl
from jax.experimental.pallas import tpu as pltpu


def top_block_kernel(x_ref,
                     wqkv_ref, bqkv_ref,
                     wp_ref, bp_ref,
                     wf1_ref, bf1_ref, wdw_ref, bdw_ref, wf2_ref, bf2_ref,
                     o_ref,
                     xx_ref,
                     *, H, W, num_heads, key_dim, d):
    HW = H * W
    x = x_ref[0]                                    # (HW, C) f32
    xb = x.astype(jnp.bfloat16)

    # ---------------- Attention ----------------
    # Single fused, lane-dense QKV matmul.  Per head h the output columns are
    # [q_h (key_dim) | k_h (key_dim) | v_h (d)].
    qkv = jnp.dot(xb, wqkv_ref[...], preferred_element_type=jnp.float32) + bqkv_ref[...]

    chunk = 2 * key_dim + d
    for h in range(num_heads):                      # unrolled, num_heads is small
        base = h * chunk
        qh = qkv[:, base:base + key_dim].astype(jnp.bfloat16)
        kh = qkv[:, base + key_dim:base + 2 * key_dim].astype(jnp.bfloat16)
        vh = qkv[:, base + 2 * key_dim:base + chunk].astype(jnp.bfloat16)
        # q @ k^T without materializing a transpose.
        attn = lax.dot_general(qh, kh, (((1,), (1,)), ((), ())),
                               preferred_element_type=jnp.float32)      # (HW, HW)
        m = jnp.max(attn, axis=-1, keepdims=True)
        e = jnp.exp(attn - m)
        s = jnp.sum(e, axis=-1, keepdims=True)
        p = e * pl.reciprocal(s, approx=True)       # divide moved to the EUP slot
        xx_ref[:, h * d:(h + 1) * d] = jnp.dot(p.astype(jnp.bfloat16), vh,
                                               preferred_element_type=jnp.float32)

    # proj = ReLU -> Conv2d_BN(dh, dim)   (BN folded into wp/bp)
    xx = jnp.maximum(xx_ref[...], 0.0).astype(jnp.bfloat16)
    attn_out = jnp.dot(xx, wp_ref[...], preferred_element_type=jnp.float32) + bp_ref[...]
    x1 = x + attn_out                               # residual 1   (HW, C)

    # ---------------- MLP ----------------
    h1 = jnp.dot(x1.astype(jnp.bfloat16), wf1_ref[...],
                 preferred_element_type=jnp.float32) + bf1_ref[...]     # (HW, hidden)
    hidden = h1.shape[-1]

    # 3x3 depthwise conv (stride 1, zero pad 1) in token layout:
    # 9 taps = sublane rolls (XLU) + iota border masks, no padded scratch round trip.
    wdw = wdw_ref[...]                              # (9, hidden), hoisted single load
    tok = lax.broadcasted_iota(jnp.int32, (HW, hidden), 0)
    col = tok % W
    row_ok = {-1: tok >= W, 1: tok < HW - W}        # source row in bounds
    col_ok = {-1: col != 0, 1: col != (W - 1)}      # source col in bounds

    acc = h1 * wdw[4:5, :]                          # center tap (dy=0, dx=0)
    for dy in (-1, 0, 1):
        for dx in (-1, 0, 1):
            if dy == 0 and dx == 0:
                continue
            shift = dy * W + dx                     # token offset of the source pixel
            r = (dy + 1) * 3 + (dx + 1)
            # shifted[t] = h1[(t + shift) mod HW]; wrapped values are masked below.
            shifted = pltpu.roll(h1, shift=(-shift) % HW, axis=0)
            valid = None
            if dy != 0:
                valid = row_ok[dy]
            if dx != 0:
                valid = col_ok[dx] if valid is None else jnp.logical_and(valid, col_ok[dx])
            shifted = jnp.where(valid, shifted, 0.0)
            acc = acc + shifted * wdw[r:r + 1, :]

    h2 = jnp.maximum(acc + bdw_ref[...], 0.0)       # act_layer = ReLU
    y = jnp.dot(h2.astype(jnp.bfloat16), wf2_ref[...],
                preferred_element_type=jnp.float32) + bf2_ref[...]

    o_ref[0] = x1 + y                               # residual 2


def _fold_qkv(params, key_dim, num_heads, d):
    """Fuse wq|wk|wv into one weight with per-head interleaved columns."""
    cw, cb = [], []
    for h in range(num_heads):
        cw += [params['wq'][:, h * key_dim:(h + 1) * key_dim],
               params['wk'][:, h * key_dim:(h + 1) * key_dim],
               params['wv'][:, h * d:(h + 1) * d]]
        cb += [params['bq'][:, h * key_dim:(h + 1) * key_dim],
               params['bk'][:, h * key_dim:(h + 1) * key_dim],
               params['bv'][:, h * d:(h + 1) * d]]
    return jnp.concatenate(cw, axis=1), jnp.concatenate(cb, axis=1)


def top_block_pallas(x_nchw, params, *, key_dim, num_heads, d):
    B, C, H, W = x_nchw.shape
    HW = H * W
    dh = num_heads * d

    x_tok = x_nchw.reshape(B, C, HW).transpose(0, 2, 1).astype(jnp.float32)  # (B, HW, C)

    wqkv, bqkv = _fold_qkv(params, key_dim, num_heads, d)
    # Matmul operands in bf16 (MXU native); biases + elementwise math stay f32.
    weights = [
        wqkv.astype(jnp.bfloat16), bqkv.astype(jnp.float32),
        params['wp'].astype(jnp.bfloat16), params['bp'].astype(jnp.float32),
        params['wf1'].astype(jnp.bfloat16), params['bf1'].astype(jnp.float32),
        params['wdw'].astype(jnp.float32), params['bdw'].astype(jnp.float32),
        params['wf2'].astype(jnp.bfloat16), params['bf2'].astype(jnp.float32),
    ]

    def full_spec(a):
        return pl.BlockSpec(a.shape, lambda b: (0,) * a.ndim)

    kernel = functools.partial(top_block_kernel, H=H, W=W,
                               num_heads=num_heads, key_dim=key_dim, d=d)

    out = pl.pallas_call(
        kernel,
        out_shape=jax.ShapeDtypeStruct((B, HW, C), jnp.float32),
        grid=(B,),
        in_specs=[pl.BlockSpec((1, HW, C), lambda b: (b, 0, 0))]
                 + [full_spec(w) for w in weights],
        out_specs=pl.BlockSpec((1, HW, C), lambda b: (b, 0, 0)),
        scratch_shapes=[pltpu.VMEM((HW, dh), jnp.float32)],   # per-head outputs land here
        compiler_params=pltpu.CompilerParams(
            dimension_semantics=("parallel",)),   # batch is independent -> 2 TCs on v7x
    )(x_tok, *weights)

    return out.transpose(0, 2, 1).reshape(B, C, H, W)


def top_block_ref(x_nchw, p, *, key_dim, num_heads, d):
    """Pure-JAX f32 reference with identical semantics (for validation)."""
    B, C, H, W = x_nchw.shape
    HW = H * W
    hidden = p['wf1'].shape[1]
    x = x_nchw.reshape(B, C, HW).transpose(0, 2, 1)  # (B, HW, C)

    q = x @ p['wq'] + p['bq']
    k = x @ p['wk'] + p['bk']
    v = x @ p['wv'] + p['bv']
    outs = []
    for h in range(num_heads):
        qh = q[..., h * key_dim:(h + 1) * key_dim]
        kh = k[..., h * key_dim:(h + 1) * key_dim]
        vh = v[..., h * d:(h + 1) * d]
        attn = jnp.einsum('bqe,bke->bqk', qh, kh)     # no scale, as in the reference fwd
        attn = jax.nn.softmax(attn, axis=-1)
        outs.append(jnp.einsum('bqk,bkd->bqd', attn, vh))
    xx = jnp.maximum(jnp.concatenate(outs, axis=-1), 0.0)
    x1 = x + (xx @ p['wp'] + p['bp'])

    h1 = x1 @ p['wf1'] + p['bf1']
    h_img = h1.transpose(0, 2, 1).reshape(B, hidden, H, W)
    wdw_pt = p['wdw'].T.reshape(hidden, 1, 3, 3)          # OIHW depthwise weight
    dw = lax.conv_general_dilated(h_img, wdw_pt, (1, 1), ((1, 1), (1, 1)),
                                  feature_group_count=hidden)
    dw = jnp.maximum(dw + p['bdw'].reshape(1, hidden, 1, 1), 0.0)
    h2 = dw.reshape(B, hidden, HW).transpose(0, 2, 1)
    y = h2 @ p['wf2'] + p['bf2']
    out = x1 + y
    return out.transpose(0, 2, 1).reshape(B, C, H, W)


def init_params(key, dim, key_dim, num_heads, attn_ratio, mlp_ratio):
    # Conv2d_BN folded into (W, b) per layer — deterministic synthetic params.
    nh_kd = key_dim * num_heads
    d = int(attn_ratio * key_dim)
    dh = d * num_heads
    hidden = int(dim * mlp_ratio)
    ks = jax.random.split(key, 14)

    def w(k, shape, scale=0.1):
        return jax.random.normal(k, shape, jnp.float32) * scale

    params = {
        'wq': w(ks[0], (dim, nh_kd)),   'bq': w(ks[1], (1, nh_kd), 0.02),
        'wk': w(ks[2], (dim, nh_kd)),   'bk': w(ks[3], (1, nh_kd), 0.02),
        'wv': w(ks[4], (dim, dh)),      'bv': w(ks[5], (1, dh), 0.02),
        'wp': w(ks[6], (dh, dim)),      'bp': w(ks[7], (1, dim), 0.02),
        'wf1': w(ks[8], (dim, hidden)), 'bf1': w(ks[9], (1, hidden), 0.02),
        # depthwise 3x3 weight stored as (9, hidden): row i*3+j holds tap (i, j)
        'wdw': w(ks[10], (9, hidden), 0.2), 'bdw': w(ks[11], (1, hidden), 0.02),
        'wf2': w(ks[12], (hidden, dim)), 'bf2': w(ks[13], (1, dim), 0.02),
    }
    return params, d, hidden


if __name__ == "__main__":
    # small shapes consistent with the module: dim=32, key_dim=16, heads=2,
    # attn_ratio=2 (-> d=32, dh=64), mlp_ratio=2 (-> hidden=64), B=2, H=W=8
    B, dim, H, W = 2, 32, 8, 8
    key_dim, num_heads = 16, 2
    attn_ratio, mlp_ratio = 2.0, 2.0

    key = jax.random.PRNGKey(0)
    kx, kp = jax.random.split(key)
    x = jax.random.normal(kx, (B, dim, H, W), jnp.float32)
    params, d, hidden = init_params(kp, dim, key_dim, num_heads, attn_ratio, mlp_ratio)

    out = top_block_pallas(x, params, key_dim=key_dim, num_heads=num_heads, d=d)
    out = jax.block_until_ready(out)

    ref = top_block_ref(x, params, key_dim=key_dim, num_heads=num_heads, d=d)
    ref = jax.block_until_ready(ref)
    max_err = float(np.max(np.abs(np.asarray(out) - np.asarray(ref))))
    # bf16 matmul operands (f32 accumulation) + approx reciprocal vs. f32 reference.
    assert np.allclose(np.asarray(out), np.asarray(ref), rtol=3e-2, atol=3e-2), max_err

    print("KERNEL_OK")
</pallas_src>

<mosaic_0001>
module attributes {stable_mosaic.version = 11 : i64} {
  func.func @top_block_kernel(%arg0: i32, %arg1: memref<1x64x32xf32, #tpu.memory_space<vmem>>, %arg2: memref<32x128xbf16, #tpu.memory_space<vmem>>, %arg3: memref<1x128xf32, #tpu.memory_space<vmem>>, %arg4: memref<64x32xbf16, #tpu.memory_space<vmem>>, %arg5: memref<1x32xf32, #tpu.memory_space<vmem>>, %arg6: memref<32x64xbf16, #tpu.memory_space<vmem>>, %arg7: memref<1x64xf32, #tpu.memory_space<vmem>>, %arg8: memref<9x64xf32, #tpu.memory_space<vmem>>, %arg9: memref<1x64xf32, #tpu.memory_space<vmem>>, %arg10: memref<64x32xbf16, #tpu.memory_space<vmem>>, %arg11: memref<1x32xf32, #tpu.memory_space<vmem>>, %arg12: memref<1x64x32xf32, #tpu.memory_space<vmem>>, %arg13: memref<64x64xf32, #tpu.memory_space<vmem>>) attributes {dimension_semantics = [#tpu.dimension_semantics<parallel>], iteration_bounds = array<i64: 2>, scalar_prefetch = 0 : i64, scratch_operands = 1 : i64, tpu.core_type = #tpu.core_type<tc>, window_params = [{transform_indices = @transform_0, window_bounds = array<i64: 1, 64, 32>}, {pipeline_mode = #tpu.pipeline_mode<synchronous>, transform_indices = @transform_1, window_bounds = array<i64: 32, 128>}, {pipeline_mode = #tpu.pipeline_mode<synchronous>, transform_indices = @transform_2, window_bounds = array<i64: 1, 128>}, {pipeline_mode = #tpu.pipeline_mode<synchronous>, transform_indices = @transform_3, window_bounds = array<i64: 64, 32>}, {pipeline_mode = #tpu.pipeline_mode<synchronous>, transform_indices = @transform_4, window_bounds = array<i64: 1, 32>}, {pipeline_mode = #tpu.pipeline_mode<synchronous>, transform_indices = @transform_5, window_bounds = array<i64: 32, 64>}, {pipeline_mode = #tpu.pipeline_mode<synchronous>, transform_indices = @transform_6, window_bounds = array<i64: 1, 64>}, {pipeline_mode = #tpu.pipeline_mode<synchronous>, transform_indices = @transform_7, window_bounds = array<i64: 9, 64>}, {pipeline_mode = #tpu.pipeline_mode<synchronous>, transform_indices = @transform_8, window_bounds = array<i64: 1, 64>}, {pipeline_mode = #tpu.pipeline_mode<synchronous>, transform_indices = @transform_9, window_bounds = array<i64: 64, 32>}, {pipeline_mode = #tpu.pipeline_mode<synchronous>, transform_indices = @transform_10, window_bounds = array<i64: 1, 32>}, {transform_indices = @transform_11, window_bounds = array<i64: 1, 64, 32>}]} {
    %c0 = arith.constant 0 : index
    %c0_0 = arith.constant 0 : index
    %c0_1 = arith.constant 0 : index
    %0 = vector.load %arg1[%c0, %c0_0, %c0_1] : memref<1x64x32xf32, #tpu.memory_space<vmem>>, vector<1x64x32xf32>
    %1 = vector.shape_cast %0 : vector<1x64x32xf32> to vector<64x32xf32>
    %2 = arith.truncf %1 : vector<64x32xf32> to vector<64x32xbf16>
    %c0_2 = arith.constant 0 : index
    %c0_3 = arith.constant 0 : index
    %3 = vector.load %arg2[%c0_2, %c0_3] : memref<32x128xbf16, #tpu.memory_space<vmem>>, vector<32x128xbf16>
    %cst = arith.constant dense<0.000000e+00> : vector<64x128xf32>
    %4 = tpu.matmul %2, %3, %cst {dimension_numbers = #tpu.dot_dimension_numbers<[1], [0], [0], [1], [0, 0, 1, 1], [], []>} : vector<64x32xbf16>, vector<32x128xbf16>, vector<64x128xf32> -> vector<64x128xf32>
    %c0_4 = arith.constant 0 : index
    %c0_5 = arith.constant 0 : index
    %5 = vector.load %arg3[%c0_4, %c0_5] : memref<1x128xf32, #tpu.memory_space<vmem>>, vector<1x128xf32>
    %6 = vector.broadcast %5 : vector<1x128xf32> to vector<64x128xf32>
    %7 = arith.addf %4, %6 : vector<64x128xf32>
    %8 = vector.extract_strided_slice %7 {offsets = [0, 0], sizes = [64, 16], strides = [1, 1]} : vector<64x128xf32> to vector<64x16xf32>
    %9 = arith.truncf %8 : vector<64x16xf32> to vector<64x16xbf16>
    %10 = vector.extract_strided_slice %7 {offsets = [0, 16], sizes = [64, 16], strides = [1, 1]} : vector<64x128xf32> to vector<64x16xf32>
    %11 = arith.truncf %10 : vector<64x16xf32> to vector<64x16xbf16>
    %12 = vector.extract_strided_slice %7 {offsets = [0, 32], sizes = [64, 32], strides = [1, 1]} : vector<64x128xf32> to vector<64x32xf32>
    %13 = arith.truncf %12 : vector<64x32xf32> to vector<64x32xbf16>
    %cst_6 = arith.constant dense<0.000000e+00> : vector<64x64xf32>
    %14 = tpu.matmul %9, %11, %cst_6 {dimension_numbers = #tpu.dot_dimension_numbers<[1], [1], [0], [0], [0, 0, 1, 0], [], []>} : vector<64x16xbf16>, vector<64x16xbf16>, vector<64x64xf32> -> vector<64x64xf32>
    %cst_7 = arith.constant dense<0xFF800000> : vector<64xf32>
    %15 = vector.multi_reduction <maximumf>, %14, %cst_7 [1] : vector<64x64xf32> to vector<64xf32>
    %16 = vector.shape_cast %15 : vector<64xf32> to vector<64x1xf32>
    %17 = vector.broadcast %16 : vector<64x1xf32> to vector<64x64xf32>
    %18 = arith.subf %14, %17 : vector<64x64xf32>
    %19 = math.exp %18 : vector<64x64xf32>
    %cst_8 = arith.constant dense<0.000000e+00> : vector<64xf32>
    %20 = vector.multi_reduction <add>, %19, %cst_8 [1] : vector<64x64xf32> to vector<64xf32>
    %21 = vector.shape_cast %20 : vector<64xf32> to vector<64x1xf32>
    %22 = tpu.reciprocal %21 {approx = true} : vector<64x1xf32> -> vector<64x1xf32>
    %23 = vector.broadcast %22 : vector<64x1xf32> to vector<64x64xf32>
    %24 = arith.mulf %19, %23 : vector<64x64xf32>
    %25 = arith.truncf %24 : vector<64x64xf32> to vector<64x64xbf16>
    %cst_9 = arith.constant dense<0.000000e+00> : vector<64x32xf32>
    %26 = tpu.matmul %25, %13, %cst_9 {dimension_numbers = #tpu.dot_dimension_numbers<[1], [0], [0], [1], [0, 0, 1, 1], [], []>} : vector<64x64xbf16>, vector<64x32xbf16>, vector<64x32xf32> -> vector<64x32xf32>
    %c0_10 = arith.constant 0 : index
    %c0_11 = arith.constant 0 : index
    %27 = vector.load %arg13[%c0_10, %c0_11] : memref<64x64xf32, #tpu.memory_space<vmem>>, vector<64x32xf32>
    tpu.vector_store %arg13[%c0_10, %c0_11], %26 {strides = array<i32>} : memref<64x64xf32, #tpu.memory_space<vmem>>, vector<64x32xf32>,
    %28 = vector.extract_strided_slice %7 {offsets = [0, 64], sizes = [64, 16], strides = [1, 1]} : vector<64x128xf32> to vector<64x16xf32>
    %29 = arith.truncf %28 : vector<64x16xf32> to vector<64x16xbf16>
    %30 = vector.extract_strided_slice %7 {offsets = [0, 80], sizes = [64, 16], strides = [1, 1]} : vector<64x128xf32> to vector<64x16xf32>
    %31 = arith.truncf %30 : vector<64x16xf32> to vector<64x16xbf16>
    %32 = vector.extract_strided_slice %7 {offsets = [0, 96], sizes = [64, 32], strides = [1, 1]} : vector<64x128xf32> to vector<64x32xf32>
    %33 = arith.truncf %32 : vector<64x32xf32> to vector<64x32xbf16>
    %cst_12 = arith.constant dense<0.000000e+00> : vector<64x64xf32>
    %34 = tpu.matmul %29, %31, %cst_12 {dimension_numbers = #tpu.dot_dimension_numbers<[1], [1], [0], [0], [0, 0, 1, 0], [], []>} : vector<64x16xbf16>, vector<64x16xbf16>, vector<64x64xf32> -> vector<64x64xf32>
    %cst_13 = arith.constant dense<0xFF800000> : vector<64xf32>
    %35 = vector.multi_reduction <maximumf>, %34, %cst_13 [1] : vector<64x64xf32> to vector<64xf32>
    %36 = vector.shape_cast %35 : vector<64xf32> to vector<64x1xf32>
    %37 = vector.broadcast %36 : vector<64x1xf32> to vector<64x64xf32>
    %38 = arith.subf %34, %37 : vector<64x64xf32>
    %39 = math.exp %38 : vector<64x64xf32>
    %cst_14 = arith.constant dense<0.000000e+00> : vector<64xf32>
    %40 = vector.multi_reduction <add>, %39, %cst_14 [1] : vector<64x64xf32> to vector<64xf32>
    %41 = vector.shape_cast %40 : vector<64xf32> to vector<64x1xf32>
    %42 = tpu.reciprocal %41 {approx = true} : vector<64x1xf32> -> vector<64x1xf32>
    %43 = vector.broadcast %42 : vector<64x1xf32> to vector<64x64xf32>
    %44 = arith.mulf %39, %43 : vector<64x64xf32>
    %45 = arith.truncf %44 : vector<64x64xf32> to vector<64x64xbf16>
    %cst_15 = arith.constant dense<0.000000e+00> : vector<64x32xf32>
    %46 = tpu.matmul %45, %33, %cst_15 {dimension_numbers = #tpu.dot_dimension_numbers<[1], [0], [0], [1], [0, 0, 1, 1], [], []>} : vector<64x64xbf16>, vector<64x32xbf16>, vector<64x32xf32> -> vector<64x32xf32>
    %c0_16 = arith.constant 0 : index
    %c32 = arith.constant 32 : index
    %47 = vector.load %arg13[%c0_16, %c32] : memref<64x64xf32, #tpu.memory_space<vmem>>, vector<64x32xf32>
    tpu.vector_store %arg13[%c0_16, %c32], %46 {strides = array<i32>} : memref<64x64xf32, #tpu.memory_space<vmem>>, vector<64x32xf32>,
    %c0_17 = arith.constant 0 : index
    %c0_18 = arith.constant 0 : index
    %48 = vector.load %arg13[%c0_17, %c0_18] : memref<64x64xf32, #tpu.memory_space<vmem>>, vector<64x64xf32>
    %cst_19 = arith.constant 0.000000e+00 : f32
    %49 = vector.broadcast %cst_19 : f32 to vector<64x64xf32>
    %50 = arith.maximumf %48, %49 : vector<64x64xf32>
    %51 = arith.truncf %50 : vector<64x64xf32> to vector<64x64xbf16>
    %c0_20 = arith.constant 0 : index
    %c0_21 = arith.constant 0 : index
    %52 = vector.load %arg4[%c0_20, %c0_21] : memref<64x32xbf16, #tpu.memory_space<vmem>>, vector<64x32xbf16>
    %cst_22 = arith.constant dense<0.000000e+00> : vector<64x32xf32>
    %53 = tpu.matmul %51, %52, %cst_22 {dimension_numbers = #tpu.dot_dimension_numbers<[1], [0], [0], [1], [0, 0, 1, 1], [], []>} : vector<64x64xbf16>, vector<64x32xbf16>, vector<64x32xf32> -> vector<64x32xf32>
    %c0_23 = arith.constant 0 : index
    %c0_24 = arith.constant 0 : index
    %54 = vector.load %arg5[%c0_23, %c0_24] : memref<1x32xf32, #tpu.memory_space<vmem>>, vector<1x32xf32>
    %55 = vector.broadcast %54 : vector<1x32xf32> to vector<64x32xf32>
    %56 = arith.addf %53, %55 : vector<64x32xf32>
    %57 = arith.addf %1, %56 : vector<64x32xf32>
    %58 = arith.truncf %57 : vector<64x32xf32> to vector<64x32xbf16>
    %c0_25 = arith.constant 0 : index
    %c0_26 = arith.constant 0 : index
    %59 = vector.load %arg6[%c0_25, %c0_26] : memref<32x64xbf16, #tpu.memory_space<vmem>>, vector<32x64xbf16>
    %cst_27 = arith.constant dense<0.000000e+00> : vector<64x64xf32>
    %60 = tpu.matmul %58, %59, %cst_27 {dimension_numbers = #tpu.dot_dimension_numbers<[1], [0], [0], [1], [0, 0, 1, 1], [], []>} : vector<64x32xbf16>, vector<32x64xbf16>, vector<64x64xf32> -> vector<64x64xf32>
    %c0_28 = arith.constant 0 : index
    %c0_29 = arith.constant 0 : index
    %61 = vector.load %arg7[%c0_28, %c0_29] : memref<1x64xf32, #tpu.memory_space<vmem>>, vector<1x64xf32>
    %62 = vector.broadcast %61 : vector<1x64xf32> to vector<64x64xf32>
    %63 = arith.addf %60, %62 : vector<64x64xf32>
    %c0_30 = arith.constant 0 : index
    %c0_31 = arith.constant 0 : index
    %64 = vector.load %arg8[%c0_30, %c0_31] : memref<9x64xf32, #tpu.memory_space<vmem>>, vector<9x64xf32>
    %65 = tpu.iota {dimensions = array<i32: 0>} : vector<64x64xi32>
    %c8_i32 = arith.constant 8 : i32
    %c0_i32 = arith.constant 0 : i32
    %66 = arith.cmpi eq, %c8_i32, %c0_i32 : i32
    %c1_i32 = arith.constant 1 : i32
    %67 = arith.select %66, %c1_i32, %c8_i32 : i32
    %68 = vector.broadcast %67 : i32 to vector<64x64xi32>
    %69 = arith.remsi %65, %68 : vector<64x64xi32>
    %c0_i32_32 = arith.constant 0 : i32
    %70 = vector.broadcast %c0_i32_32 : i32 to vector<64x64xi32>
    %71 = arith.cmpi ne, %69, %70 : vector<64x64xi32>
    %c0_i32_33 = arith.constant 0 : i32
    %72 = vector.broadcast %c0_i32_33 : i32 to vector<64x64xi32>
    %73 = arith.cmpi slt, %69, %72 : vector<64x64xi32>
    %c0_i32_34 = arith.constant 0 : i32
    %74 = arith.cmpi slt, %67, %c0_i32_34 : i32
    %75 = vector.broadcast %74 : i1 to vector<64x64xi1>
    %76 = vector.broadcast %75 : vector<64x64xi1> to vector<64x64xi1>
    %77 = arith.xori %73, %76 : vector<64x64xi1>
    %78 = arith.andi %77, %71 : vector<64x64xi1>
    %79 = vector.broadcast %67 : i32 to vector<64x64xi32>
    %80 = arith.addi %69, %79 : vector<64x64xi32>
    %81 = arith.select %78, %80, %69 : vector<64x64xi1>, vector<64x64xi32>
    %c8_i32_35 = arith.constant 8 : i32
    %82 = vector.broadcast %c8_i32_35 : i32 to vector<64x64xi32>
    %83 = arith.cmpi sge, %65, %82 : vector<64x64xi32>
    %c56_i32 = arith.constant 56 : i32
    %84 = vector.broadcast %c56_i32 : i32 to vector<64x64xi32>
    %85 = arith.cmpi slt, %65, %84 : vector<64x64xi32>
    %c0_i32_36 = arith.constant 0 : i32
    %86 = vector.broadcast %c0_i32_36 : i32 to vector<64x64xi32>
    %87 = arith.cmpi ne, %81, %86 : vector<64x64xi32>
    %c7_i32 = arith.constant 7 : i32
    %88 = vector.broadcast %c7_i32 : i32 to vector<64x64xi32>
    %89 = arith.cmpi ne, %81, %88 : vector<64x64xi32>
    %90 = vector.extract_strided_slice %64 {offsets = [4, 0], sizes = [1, 64], strides = [1, 1]} : vector<9x64xf32> to vector<1x64xf32>
    %91 = vector.broadcast %90 : vector<1x64xf32> to vector<64x64xf32>
    %92 = arith.mulf %63, %91 : vector<64x64xf32>
    %c9_i32 = arith.constant 9 : i32
    %93 = tpu.dynamic_rotate %63 by %c9_i32 dim 0 : vector<64x64xf32>, i32 -> vector<64x64xf32>
    %94 = arith.andi %83, %87 : vector<64x64xi1>
    %cst_37 = arith.constant 0.000000e+00 : f32
    %95 = vector.broadcast %cst_37 : f32 to vector<64x64xf32>
    %96 = arith.select %94, %93, %95 : vector<64x64xi1>, vector<64x64xf32>
    %97 = vector.extract_strided_slice %64 {offsets = [0, 0], sizes = [1, 64], strides = [1, 1]} : vector<9x64xf32> to vector<1x64xf32>
    %98 = vector.broadcast %97 : vector<1x64xf32> to vector<64x64xf32>
    %99 = arith.mulf %96, %98 : vector<64x64xf32>
    %100 = arith.addf %92, %99 : vector<64x64xf32>
    %c8_i32_38 = arith.constant 8 : i32
    %101 = tpu.dynamic_rotate %63 by %c8_i32_38 dim 0 : vector<64x64xf32>, i32 -> vector<64x64xf32>
    %cst_39 = arith.constant 0.000000e+00 : f32
    %102 = vector.broadcast %cst_39 : f32 to vector<64x64xf32>
    %103 = arith.select %83, %101, %102 : vector<64x64xi1>, vector<64x64xf32>
    %104 = vector.extract_strided_slice %64 {offsets = [1, 0], sizes = [1, 64], strides = [1, 1]} : vector<9x64xf32> to vector<1x64xf32>
    %105 = vector.broadcast %104 : vector<1x64xf32> to vector<64x64xf32>
    %106 = arith.mulf %103, %105 : vector<64x64xf32>
    %107 = arith.addf %100, %106 : vector<64x64xf32>
    %c7_i32_40 = arith.constant 7 : i32
    %108 = tpu.dynamic_rotate %63 by %c7_i32_40 dim 0 : vector<64x64xf32>, i32 -> vector<64x64xf32>
    %109 = arith.andi %83, %89 : vector<64x64xi1>
    %cst_41 = arith.constant 0.000000e+00 : f32
    %110 = vector.broadcast %cst_41 : f32 to vector<64x64xf32>
    %111 = arith.select %109, %108, %110 : vector<64x64xi1>, vector<64x64xf32>
    %112 = vector.extract_strided_slice %64 {offsets = [2, 0], sizes = [1, 64], strides = [1, 1]} : vector<9x64xf32> to vector<1x64xf32>
    %113 = vector.broadcast %112 : vector<1x64xf32> to vector<64x64xf32>
    %114 = arith.mulf %111, %113 : vector<64x64xf32>
    %115 = arith.addf %107, %114 : vector<64x64xf32>
    %c1_i32_42 = arith.constant 1 : i32
    %116 = tpu.dynamic_rotate %63 by %c1_i32_42 dim 0 : vector<64x64xf32>, i32 -> vector<64x64xf32>
    %cst_43 = arith.constant 0.000000e+00 : f32
    %117 = vector.broadcast %cst_43 : f32 to vector<64x64xf32>
    %118 = arith.select %87, %116, %117 : vector<64x64xi1>, vector<64x64xf32>
    %119 = vector.extract_strided_slice %64 {offsets = [3, 0], sizes = [1, 64], strides = [1, 1]} : vector<9x64xf32> to vector<1x64xf32>
    %120 = vector.broadcast %119 : vector<1x64xf32> to vector<64x64xf32>
    %121 = arith.mulf %118, %120 : vector<64x64xf32>
    %122 = arith.addf %115, %121 : vector<64x64xf32>
    %c63_i32 = arith.constant 63 : i32
    %123 = tpu.dynamic_rotate %63 by %c63_i32 dim 0 : vector<64x64xf32>, i32 -> vector<64x64xf32>
    %cst_44 = arith.constant 0.000000e+00 : f32
    %124 = vector.broadcast %cst_44 : f32 to vector<64x64xf32>
    %125 = arith.select %89, %123, %124 : vector<64x64xi1>, vector<64x64xf32>
    %126 = vector.extract_strided_slice %64 {offsets = [5, 0], sizes = [1, 64], strides = [1, 1]} : vector<9x64xf32> to vector<1x64xf32>
    %127 = vector.broadcast %126 : vector<1x64xf32> to vector<64x64xf32>
    %128 = arith.mulf %125, %127 : vector<64x64xf32>
    %129 = arith.addf %122, %128 : vector<64x64xf32>
    %c57_i32 = arith.constant 57 : i32
    %130 = tpu.dynamic_rotate %63 by %c57_i32 dim 0 : vector<64x64xf32>, i32 -> vector<64x64xf32>
    %131 = arith.andi %85, %87 : vector<64x64xi1>
    %cst_45 = arith.constant 0.000000e+00 : f32
    %132 = vector.broadcast %cst_45 : f32 to vector<64x64xf32>
    %133 = arith.select %131, %130, %132 : vector<64x64xi1>, vector<64x64xf32>
    %134 = vector.extract_strided_slice %64 {offsets = [6, 0], sizes = [1, 64], strides = [1, 1]} : vector<9x64xf32> to vector<1x64xf32>
    %135 = vector.broadcast %134 : vector<1x64xf32> to vector<64x64xf32>
    %136 = arith.mulf %133, %135 : vector<64x64xf32>
    %137 = arith.addf %129, %136 : vector<64x64xf32>
    %c56_i32_46 = arith.constant 56 : i32
    %138 = tpu.dynamic_rotate %63 by %c56_i32_46 dim 0 : vector<64x64xf32>, i32 -> vector<64x64xf32>
    %cst_47 = arith.constant 0.000000e+00 : f32
    %139 = vector.broadcast %cst_47 : f32 to vector<64x64xf32>
    %140 = arith.select %85, %138, %139 : vector<64x64xi1>, vector<64x64xf32>
    %141 = vector.extract_strided_slice %64 {offsets = [7, 0], sizes = [1, 64], strides = [1, 1]} : vector<9x64xf32> to vector<1x64xf32>
    %142 = vector.broadcast %141 : vector<1x64xf32> to vector<64x64xf32>
    %143 = arith.mulf %140, %142 : vector<64x64xf32>
    %144 = arith.addf %137, %143 : vector<64x64xf32>
    %c55_i32 = arith.constant 55 : i32
    %145 = tpu.dynamic_rotate %63 by %c55_i32 dim 0 : vector<64x64xf32>, i32 -> vector<64x64xf32>
    %146 = arith.andi %85, %89 : vector<64x64xi1>
    %cst_48 = arith.constant 0.000000e+00 : f32
    %147 = vector.broadcast %cst_48 : f32 to vector<64x64xf32>
    %148 = arith.select %146, %145, %147 : vector<64x64xi1>, vector<64x64xf32>
    %149 = vector.extract_strided_slice %64 {offsets = [8, 0], sizes = [1, 64], strides = [1, 1]} : vector<9x64xf32> to vector<1x64xf32>
    %150 = vector.broadcast %149 : vector<1x64xf32> to vector<64x64xf32>
    %151 = arith.mulf %148, %150 : vector<64x64xf32>
    %152 = arith.addf %144, %151 : vector<64x64xf32>
    %c0_49 = arith.constant 0 : index
    %c0_50 = arith.constant 0 : index
    %153 = vector.load %arg9[%c0_49, %c0_50] : memref<1x64xf32, #tpu.memory_space<vmem>>, vector<1x64xf32>
    %154 = vector.broadcast %153 : vector<1x64xf32> to vector<64x64xf32>
    %155 = arith.addf %152, %154 : vector<64x64xf32>
    %cst_51 = arith.constant 0.000000e+00 : f32
    %156 = vector.broadcast %cst_51 : f32 to vector<64x64xf32>
    %157 = arith.maximumf %155, %156 : vector<64x64xf32>
    %158 = arith.truncf %157 : vector<64x64xf32> to vector<64x64xbf16>
    %c0_52 = arith.constant 0 : index
    %c0_53 = arith.constant 0 : index
    %159 = vector.load %arg10[%c0_52, %c0_53] : memref<64x32xbf16, #tpu.memory_space<vmem>>, vector<64x32xbf16>
    %cst_54 = arith.constant dense<0.000000e+00> : vector<64x32xf32>
    %160 = tpu.matmul %158, %159, %cst_54 {dimension_numbers = #tpu.dot_dimension_numbers<[1], [0], [0], [1], [0, 0, 1, 1], [], []>} : vector<64x64xbf16>, vector<64x32xbf16>, vector<64x32xf32> -> vector<64x32xf32>
    %c0_55 = arith.constant 0 : index
    %c0_56 = arith.constant 0 : index
    %161 = vector.load %arg11[%c0_55, %c0_56] : memref<1x32xf32, #tpu.memory_space<vmem>>, vector<1x32xf32>
    %162 = vector.broadcast %161 : vector<1x32xf32> to vector<64x32xf32>
    %163 = arith.addf %160, %162 : vector<64x32xf32>
    %164 = arith.addf %57, %163 : vector<64x32xf32>
    %c0_57 = arith.constant 0 : index
    %c0_58 = arith.constant 0 : index
    %c0_59 = arith.constant 0 : index
    %165 = vector.load %arg12[%c0_57, %c0_58, %c0_59] : memref<1x64x32xf32, #tpu.memory_space<vmem>>, vector<1x64x32xf32>
    %166 = vector.shape_cast %165 : vector<1x64x32xf32> to vector<64x32xf32>
    %167 = vector.shape_cast %164 : vector<64x32xf32> to vector<1x64x32xf32>
    tpu.vector_store %arg12[%c0_57, %c0_58, %c0_59], %167 {strides = array<i32>} : memref<1x64x32xf32, #tpu.memory_space<vmem>>, vector<1x64x32xf32>,
    return
  }
  func.func @transform_0(%arg0: i32) -> (i32, i32, i32) {
    %c0_i32 = arith.constant 0 : i32
    %c0_i32_0 = arith.constant 0 : i32
    %c0_i32_1 = arith.constant 0 : i32
    return %arg0, %c0_i32, %c0_i32_0 : i32, i32, i32
  }
  func.func @transform_1(%arg0: i32) -> (i32, i32) {
    %c0_i32 = arith.constant 0 : i32
    %c0_i32_0 = arith.constant 0 : i32
    %c0_i32_1 = arith.constant 0 : i32
    return %c0_i32, %c0_i32_0 : i32, i32
  }
  func.func @transform_2(%arg0: i32) -> (i32, i32) {
    %c0_i32 = arith.constant 0 : i32
    %c0_i32_0 = arith.constant 0 : i32
    %c0_i32_1 = arith.constant 0 : i32
    return %c0_i32, %c0_i32_0 : i32, i32
  }
  func.func @transform_3(%arg0: i32) -> (i32, i32) {
    %c0_i32 = arith.constant 0 : i32
    %c0_i32_0 = arith.constant 0 : i32
    %c0_i32_1 = arith.constant 0 : i32
    return %c0_i32, %c0_i32_0 : i32, i32
  }
  func.func @transform_4(%arg0: i32) -> (i32, i32) {
    %c0_i32 = arith.constant 0 : i32
    %c0_i32_0 = arith.constant 0 : i32
    %c0_i32_1 = arith.constant 0 : i32
    return %c0_i32, %c0_i32_0 : i32, i32
  }
  func.func @transform_5(%arg0: i32) -> (i32, i32) {
    %c0_i32 = arith.constant 0 : i32
    %c0_i32_0 = arith.constant 0 : i32
    %c0_i32_1 = arith.constant 0 : i32
    return %c0_i32, %c0_i32_0 : i32, i32
  }
  func.func @transform_6(%arg0: i32) -> (i32, i32) {
    %c0_i32 = arith.constant 0 : i32
    %c0_i32_0 = arith.constant 0 : i32
    %c0_i32_1 = arith.constant 0 : i32
    return %c0_i32, %c0_i32_0 : i32, i32
  }
  func.func @transform_7(%arg0: i32) -> (i32, i32) {
    %c0_i32 = arith.constant 0 : i32
    %c0_i32_0 = arith.constant 0 : i32
    %c0_i32_1 = arith.constant 0 : i32
    return %c0_i32, %c0_i32_0 : i32, i32
  }
  func.func @transform_8(%arg0: i32) -> (i32, i32) {
    %c0_i32 = arith.constant 0 : i32
    %c0_i32_0 = arith.constant 0 : i32
    %c0_i32_1 = arith.constant 0 : i32
    return %c0_i32, %c0_i32_0 : i32, i32
  }
  func.func @transform_9(%arg0: i32) -> (i32, i32) {
    %c0_i32 = arith.constant 0 : i32
    %c0_i32_0 = arith.constant 0 : i32
    %c0_i32_1 = arith.constant 0 : i32
    return %c0_i32, %c0_i32_0 : i32, i32
  }
  func.func @transform_10(%arg0: i32) -> (i32, i32) {
    %c0_i32 = arith.constant 0 : i32
    %c0_i32_0 = arith.constant 0 : i32
    %c0_i32_1 = arith.constant 0 : i32
    return %c0_i32, %c0_i32_0 : i32, i32
  }
  func.func @transform_11(%arg0: i32) -> (i32, i32, i32) {
    %c0_i32 = arith.constant 0 : i32
    %c0_i32_0 = arith.constant 0 : i32
    %c0_i32_1 = arith.constant 0 : i32
    return %arg0, %c0_i32, %c0_i32_0 : i32, i32, i32
  }
}

</mosaic_0001>

<bundles_post_ra>
// kernel: tpu_custom_call.1
= control target key start
LH: loop header
LB: loop body
LE: loop exit
PB: predicated region body
PF: predicated region fallthrough
CT: control target
= control target key end

     0   :  { %s2440_s17 = smov 0   ;;  %s3309_s0 = inlined_call_operand.vmem [shape: f32[2,64,32], index: 0, kind: input, shape index: {}]   ;;  %s3310_s1 = inlined_call_operand.vmem [shape: bf16[32,128], index: 1, kind: input, shape index: {}]   ;;  %s3311_s2 = inlined_call_operand.vmem [shape: f32[1,128], index: 2, kind: input, shape index: {}]   ;;  %s3312_s3 = inlined_call_operand.vmem [shape: bf16[64,32], index: 3, kind: input, shape index: {}]   ;;  %s3313_s4 = inlined_call_operand.vmem [shape: f32[1,32], index: 4, kind: input, shape index: {}]   ;;  %s3314_s5 = inlined_call_operand.vmem [shape: bf16[32,64], index: 5, kind: input, shape index: {}]   ;;  %s3315_s6 = inlined_call_operand.vmem [shape: f32[1,64], index: 6, kind: input, shape index: {}]   ;;  %s3316_s7 = inlined_call_operand.vmem [shape: f32[9,64], index: 7, kind: input, shape index: {}]   ;;  %s3317_s8 = inlined_call_operand.vmem [shape: f32[1,64], index: 8, kind: input, shape index: {}]   ;;  %s3318_s9 = inlined_call_operand.vmem [shape: bf16[64,32], index: 9, kind: input, shape index: {}]   ;;  %s3319_s10 = inlined_call_operand.vmem [shape: f32[1,32], index: 10, kind: input, shape index: {}]   ;;  %s3320_s11 = inlined_call_operand.vmem [shape: f32[2,64,32], index: 11, kind: output, shape index: {}]  }
   0x1 LB: > { %s2027_s18 = sadd.s32 4294967295, %s2373_s17   ;;  %p2031_p0 = scmp.ge.s32.totalorder %s2373_s17, 1  ;;  %s2373_s17 = sphi %s2440_s17, %s21_s17  }
   0x2   : > { %p337_p1 = scmp.lt.s32.totalorder %s2373_s17, 3 }
   0x4   : > { %p338_p2 = pnand %p2031_p0, %p337_p1 }
   0x6   : > { %341 = sbr.rel (%p338_p2) target bundleno = 2610 (0xa32), region = 64 }
   0xd   : > { %v2291_v0 = vld [vmem:[%s3310_s1] sm:$0xff]   ;;  %p377_p3 = scmp.lt.s32.totalorder %s2027_s18, 1  ;;  %v2292_v1 = vld [vmem:[%s3310_s1 + $0x8] sm:$0xff]   ;;  %vm3333_vm0 = vcmask 261120   ;;  %vm517_vm1 = vcmask 130048   ;;  %s2375_s29 = smov 112  }
   0xe   : > { %2150 = vmatprep.subr.bf16.mxu0 %v2291_v0  ;;  %v2036_v15 = vld [vmem:[%s3311_s2] ss:$0 sm:$0xff]  ;;  %vm607_vm2 = vcmask 523264   ;;  %s2376_s30 = smov 96   ;;  %s2377_s12 = smov 48   ;;  %vm1115_vm3 = vcmask 523520  }
   0xf   : > { %s3426_s18 = smov (!%p377_p3, %s2027_s18), 1  ;;  %2151 = vmatpush3.bf16.msra.mxu0 %v2291_v0  ;;  %s2378_s13 = smov 64  }
  0x10   : > { %2152 = vmatprep.subr.bf16.mxu0 %v2292_v1  ;;  %s2088_s23 = sshll.u32 %s3426_s18, 6  ;;  %s2379_s14 = smov 32  }
  0x11   : > { %s381_s26 = scalar_lea.vmem %s3309_s0, %s2088_s23  ;;  %s386_s19 = scalar_lea.vmem %s3320_s11, %s2088_s23 }
  0x12   : > { %v2462_v2 = vld [vmem:[%s381_s26] sm:$0xff]  ;;  %v2464_v3 = vld [vmem:[%s381_s26 + $0x8] sm:$0xff]  ;;  %v2466_v4 = vld [vmem:[%s381_s26 + $0x10] sm:$0xff] }
  0x13   : > { %2153 = vmatpush3.bf16.msra.mxu0 %v2292_v1  ;;  %v396_v5 = vpack.c.bf16 %v2464_v3, %v2462_v2  ;;  %v2470_v6 = vld [vmem:[%s381_s26 + $0x18] sm:$0xff]  ;;  %v2472_v7 = vld [vmem:[%s381_s26 + $0x20] sm:$0xff]  ;;  %v2474_v8 = vld [vmem:[%s381_s26 + $0x28] sm:$0xff] }
  0x14   : > { %v397_v9 = vpack.c.bf16 %v2470_v6, %v2466_v4  ;;  %v398_v10 = vpack.c.bf16 %v2474_v8, %v2472_v7  ;;  %v2481_v11 = vld [vmem:[%s381_s26 + $0x30] sm:$0xff]  ;;  %v2483_v12 = vld [vmem:[%s381_s26 + $0x38] sm:$0xff] }
  0x15   : > { %2154 = vmatprep.mubr.msk.bf16.mxu0 %vm3333_vm0, %v396_v5  ;;  %v399_v13 = vpack.c.bf16 %v2483_v12, %v2481_v11 }
  0x16   : > { %2155 = vmatmul.mubr.msk.bf16.vlgmr.msra.gmra.mrb[0].mxu0 %vm3333_vm0, %v397_v9 }
  0x17   : > { %2158 = vmatprep.mubr.msk.bf16.mxu0 %vm3333_vm0, %v398_v10 }
  0x1e   : > { %2159 = vmatmul.mubr.msk.bf16.gmra.mrb[4].mxu0 %vm3333_vm0, %v399_v13 }
  0xe9   : > { %v2156_v14 = vpop.f32.mrb[0].mxu0 }
  0xea   : > { %v470_v16 = vpop.f32.mrb[1].mxu0  ;;  %v479_v18 = vadd.f32 %v2156_v14, %v2036_v15 }
  0xeb   : > { %v2157_v17 = vpop.f32.mrb[2].mxu0  ;;  %v471_v21 = vadd.f32 %v2036_v15, %v470_v16 }
  0xec   : > { %v482_v19 = vadd.f32 %v2157_v17, %v2036_v15  ;;  %v473_v20 = vpop.f32.mrb[3].mxu0 }
  0xed   : > { %v474_v22 = vadd.f32 %v2036_v15, %v473_v20 }
  0xee   : > { %v2493_v23 = vpack.c.bf16 %v482_v19, %v479_v18 }
  0xef   : > { %v2495_v24 = vpack.c.bf16 %v474_v22, %v471_v21 }
  0xf1   : > { %509 = vrot.lane.b32.xlu0 %v2495_v24, %s2375_s29  ;;  %2170 = vmatprep.mubr.msk.bf16.mxu1 %vm517_vm1, %v2495_v24  ;;  %v2160_v25 = vpop.f32.mrb[4].mxu0 }
  0xf2   : > { %v495_v26 = vadd.f32 %v2160_v25, %v2036_v15  ;;  %v486_v27 = vpop.f32.mrb[5].mxu0 }
  0xf3   : > { %v487_v28 = vadd.f32 %v2036_v15, %v486_v27  ;;  %v2161_v29 = vpop.f32.mrb[6].mxu0 }
  0xf4   : > { %v498_v30 = vadd.f32 %v2161_v29, %v2036_v15  ;;  %v489_v31 = vpop.f32.mrb[7].mxu0 }
  0xf5   : > { %v490_v32 = vadd.f32 %v2036_v15, %v489_v31  ;;  %511 = vrot.lane.b32.xlu0 %v2493_v23, %s2375_s29 }
  0xf6   : > { %v2501_v33 = vpack.c.bf16 %v498_v30, %v495_v26 }
  0xf7   : > { %v2503_v34 = vpack.c.bf16 %v490_v32, %v487_v28 }
  0xf9   : > { %513 = vrot.lane.b32.xlu1 %v2503_v34, %s2375_s29 }
  0xfd   : > { %515 = vrot.lane.b32.xlu1 %v2501_v33, %s2375_s29 }
 0x163   : > { %v510_v35 = vpop.permute.xlu0 %509 }
 0x164   : > { %2270 = vmatprep.subr.msk.bf16.mxu1 %vm517_vm1, %v510_v35  ;;  %v531_v36 = vsel %vm517_vm1, %v510_v35, 0 }
 0x165   : > { %2163 = vmatpush3.bf16.xpose.msra.mxu1 %v531_v36 }
 0x167   : > { %v512_v37 = vpop.permute.xlu0 %511 }
 0x168   : > { %2271 = vmatprep.subr.msk.bf16.mxu1 %vm517_vm1, %v512_v37  ;;  %v534_v38 = vsel %vm517_vm1, %v512_v37, 0 }
 0x16b   : > { %v514_v39 = vpop.permute.xlu1 %513 }
 0x16c   : > { %v537_v40 = vsel %vm517_vm1, %v514_v39, 0 }
 0x16d   : > { %2165 = vmatpush3.bf16.xpose.msra.mxu1 %v534_v38 }
 0x16e   : > { %2272 = vmatprep.subr.msk.bf16.mxu1 %vm517_vm1, %v514_v39 }
 0x16f   : > { %v516_v41 = vpop.permute.xlu1 %515 }
 0x170   : > { %v540_v42 = vsel %vm517_vm1, %v516_v41, 0 }
 0x175   : > { %2167 = vmatpush3.bf16.xpose.msra.mxu1 %v537_v40 }
 0x176   : > { %2273 = vmatprep.subr.msk.bf16.mxu1 %vm517_vm1, %v516_v41 }
 0x17d   : > { %2169 = vmatpush3.bf16.xpose.msra.mxu1 %v540_v42 }
 0x184   : > { %2171 = vmatmul.mubr.msk.bf16.vlgmr.msra.gmra.mrb[0].mxu1 %vm517_vm1, %v2493_v23 }
 0x185   : > { %2174 = vmatprep.mubr.msk.bf16.mxu1 %vm517_vm1, %v2503_v34 }
 0x18c   : > { %2175 = vmatmul.mubr.msk.bf16.gmra.mrb[4].mxu1 %vm517_vm1, %v2501_v33 }
 0x257   : > { %v2172_v43 = vpop.f32.mrb[0].mxu1 }
 0x258   : > { %v576_v44 = vpop.f32.mrb[1].mxu1  ;;  %v614_v45 = vsel %vm607_vm2, %v2172_v43, -inf }
 0x259   : > { %615 = vmax.xlane.f32.xlu0 %v614_v45  ;;  %v2173_v46 = vpop.f32.mrb[2].mxu1  ;;  %v608_v49 = vsel %vm607_vm2, %v576_v44, -inf }
 0x25a   : > { %v579_v47 = vpop.f32.mrb[3].mxu1  ;;  %v617_v52 = vsel %vm607_vm2, %v2173_v46, -inf }
 0x25b   : > { %v611_v48 = vsel %vm607_vm2, %v579_v47, -inf }
 0x25c   : > { %612 = vmax.xlane.f32.xlu1 %v611_v48 }
 0x25d   : > { %609 = vmax.xlane.f32.xlu0 %v608_v49 }
 0x25f   : > { %v2176_v50 = vpop.f32.mrb[4].mxu1 }
 0x260   : > { %v592_v51 = vpop.f32.mrb[5].mxu1  ;;  %v626_v53 = vsel %vm607_vm2, %v2176_v50, -inf }
 0x261   : > { %618 = vmax.xlane.f32.xlu0 %v617_v52  ;;  %627 = vmax.xlane.f32.xlu1 %v626_v53  ;;  %v2177_v54 = vpop.f32.mrb[6].mxu1  ;;  %v620_v57 = vsel %vm607_vm2, %v592_v51, -inf }
 0x262   : > { %v2526_v55 = vpop.f32.mrb[7].mxu1  ;;  %v629_v58 = vsel %vm607_vm2, %v2177_v54, -inf }
 0x263   : > { %v623_v56 = vsel %vm607_vm2, %v2526_v55, -inf }
 0x265   : > { %621 = vmax.xlane.f32.xlu1 %v620_v57  ;;  %624 = vmax.xlane.f32.xlu0 %v623_v56 }
 0x269   : > { %630 = vmax.xlane.f32.xlu0 %v629_v58 }
 0x276   : > { %700 = vrot.lane.b32.xlu1 %v2495_v24, %s2376_s30 }
 0x27a   : > { %704 = vrot.lane.b32.xlu1 %v2503_v34, %s2376_s30 }
 0x27e   : > { %706 = vrot.lane.b32.xlu1 %v2501_v33, %s2376_s30 }
 0x27f   : > { %702 = vrot.lane.b32.xlu0 %v2493_v23, %s2376_s30 }
 0x282   : > { %805 = vrot.lane.b32.xlu1 %v2495_v24, %s2377_s12 }
 0x2e6   : > { %v616_v59 = vpop.xlane.xlu0 %615 }
 0x2e7   : > { %v634_v60 = vsub.f32 %v2172_v43, %v616_v59 }
 0x2e9   : > { %v644_v61 = vmul.f32 1.442695, %v634_v60  ;;  %v613_v62 = vpop.xlane.xlu1 %612 }
 0x2ea   : > { %v610_v63 = vpop.xlane.xlu0 %609  ;;  %v633_v1 = vsub.f32 %v579_v47, %v613_v62 }
 0x2eb   : > { %2303 = vpow2.f32 %v644_v61  ;;  %v632_v0 = vsub.f32 %v576_v44, %v610_v63 }
 0x2ec   : > { %v642_v14 = vmul.f32 1.442695, %v633_v1 }
 0x2ed   : > { %v640_v5 = vmul.f32 1.442695, %v632_v0 }
 0x2ee   : > { %v619_v9 = vpop.xlane.xlu0 %618  ;;  %v628_v10 = vpop.xlane.xlu1 %627 }
 0x2ef   : > { %2305 = vpow2.f32 %v640_v5  ;;  %v635_v13 = vsub.f32 %v2173_v46, %v619_v9  ;;  %v638_v16 = vsub.f32 %v2176_v50, %v628_v10 }
 0x2f1   : > { %v646_v15 = vmul.f32 1.442695, %v635_v13  ;;  %v652_v20 = vmul.f32 1.442695, %v638_v16 }
 0x2f2   : > { %v622_v17 = vpop.xlane.xlu1 %621  ;;  %v625_v18 = vpop.xlane.xlu0 %624 }
 0x2f3   : > { %2307 = vpow2.f32 %v646_v15  ;;  %v636_v21 = vsub.f32 %v592_v51, %v622_v17  ;;  %v637_v48 = vsub.f32 %v2526_v55, %v625_v18 }
 0x2f4   : > { %2309 = vpow2.f32 %v642_v14 }
 0x2f5   : > { %v2538_v19 = vpop.eup %2303  ;;  %2311 = vpow2.f32 %v652_v20  ;;  %v648_v28 = vmul.f32 1.442695, %v636_v21  ;;  %v650_v49 = vmul.f32 1.442695, %v637_v48 }
 0x2f6   : > { %v701_v22 = vpop.permute.xlu1 %700  ;;  %v631_v25 = vpop.xlane.xlu0 %630  ;;  %v662_v26 = vsel %vm607_vm2, %v2538_v19, 0.0 }
 0x2f7   : > { %663 = vadd.xlane.f32.xlu1 %v662_v26  ;;  %2178 = vmatprep.subr.bf16.mxu0 %v701_v22  ;;  %v639_v29 = vsub.f32 %v2177_v54, %v631_v25  ;;  %2313 = vpow2.f32 %v648_v28 }
 0x2f8   : > { %2179 = vmatpush3.bf16.msra.mxu0 %v701_v22 }
 0x2f9   : > { %v2542_v27 = vpop.eup %2305  ;;  %v654_v36 = vmul.f32 1.442695, %v639_v29 }
 0x2fa   : > { %v705_v30 = vpop.permute.xlu1 %704  ;;  %v703_v31 = vpop.permute.xlu0 %702  ;;  %v656_v32 = vsel %vm607_vm2, %v2542_v27, 0.0 }
 0x2fb   : > { %657 = vadd.xlane.f32.xlu1 %v656_v32  ;;  %2180 = vmatprep.subr.bf16.mxu0 %v703_v31  ;;  %2315 = vpow2.f32 %v654_v36 }
 0x2fc   : > { %2181 = vmatpush3.bf16.msra.mxu0 %v703_v31  ;;  %2317 = vpow2.f32 %v650_v49 }
 0x2fd   : > { %v2308_v35 = vpop.eup %2307  ;;  %2182 = vmatprep.subr.bf16.mxu0 %v705_v30 }
 0x2fe   : > { %v707_v37 = vpop.permute.xlu1 %706  ;;  %v665_v38 = vsel %vm607_vm2, %v2308_v35, 0.0  ;;  %v2310_v39 = vpop.eup %2309 }
 0x2ff   : > { %666 = vadd.xlane.f32.xlu0 %v665_v38  ;;  %v659_v40 = vsel %vm607_vm2, %v2310_v39, 0.0  ;;  %v2548_v41 = vpop.eup %2311 }
 0x300   : > { %2183 = vmatpush3.bf16.msra.mxu0 %v705_v30  ;;  %v674_v43 = vsel %vm607_vm2, %v2548_v41, 0.0 }
 0x301   : > { %2184 = vmatprep.subr.bf16.mxu0 %v707_v37  ;;  %v2553_v44 = vpop.eup %2313 }
 0x302   : > { %v806_v42 = vpop.permute.xlu1 %805  ;;  %v668_v45 = vsel %vm607_vm2, %v2553_v44, 0.0 }
 0x303   : > { %660 = vadd.xlane.f32.xlu0 %v659_v40  ;;  %v826_v14 = vsel %vm517_vm1, %v806_v42, 0 }
 0x304   : > { %2185 = vmatpush3.bf16.msra.mxu0 %v707_v37 }
 0x305   : > { %2274 = vmatprep.subr.msk.bf16.mxu0 %vm517_vm1, %v806_v42  ;;  %v2557_v46 = vpop.eup %2315 }
 0x306   : > { %v677_v47 = vsel %vm607_vm2, %v2557_v46, 0.0  ;;  %v2318_v50 = vpop.eup %2317 }
 0x307   : > { %675 = vadd.xlane.f32.xlu0 %v674_v43  ;;  %v671_v51 = vsel %vm607_vm2, %v2318_v50, 0.0 }
 0x30b   : > { %669 = vadd.xlane.f32.xlu0 %v668_v45 }
 0x30c   : > { %809 = vrot.lane.b32.xlu1 %v2503_v34, %s2377_s12 }
 0x30f   : > { %678 = vadd.xlane.f32.xlu0 %v677_v47 }
 0x325   : > { %807 = vrot.lane.b32.xlu0 %v2493_v23, %s2377_s12 }
 0x329   : > { %797 = vrot.lane.b32.xlu0 %v2495_v24, %s2378_s13 }
 0x32d   : > { %801 = vrot.lane.b32.xlu0 %v2503_v34, %s2378_s13 }
 0x330   : > { %672 = vadd.xlane.f32.xlu1 %v671_v51 }
 0x341   : > { %811 = vrot.lane.b32.xlu1 %v2501_v33, %s2377_s12 }
 0x345   : > { %799 = vrot.lane.b32.xlu1 %v2493_v23, %s2378_s13 }
 0x349   : > { %803 = vrot.lane.b32.xlu1 %v2501_v33, %s2378_s13 }
 0x384   : > { %v664_v52 = vpop.xlane.xlu1 %663 }
 0x388   : > { %v658_v53 = vpop.xlane.xlu1 %657 }
 0x38c   : > { %v667_v54 = vpop.xlane.xlu0 %666  ;;  %v810_v16 = vpop.permute.xlu1 %809 }
 0x38d   : > { %2319 = vrcp.f32 %v667_v54  ;;  %v832_v17 = vsel %vm517_vm1, %v810_v16, 0 }
 0x38e   : > { %2321 = vrcp.f32 %v658_v53 }
 0x38f   : > { %2323 = vrcp.f32 %v664_v52 }
 0x390   : > { %v661_v55 = vpop.xlane.xlu0 %660 }
 0x391   : > { %2325 = vrcp.f32 %v661_v55 }
 0x394   : > { %v676_v56 = vpop.xlane.xlu0 %675 }
 0x397   : > { %v2320_v57 = vpop.eup %2319 }
 0x398   : > { %v670_v58 = vpop.xlane.xlu0 %669  ;;  %v2322_v59 = vpop.eup %2321  ;;  %v691_v62 = vmul.f32 %v2320_v57, %v2308_v35 }
 0x399   : > { %v2324_v60 = vpop.eup %2323  ;;  %v688_v0 = vmul.f32 %v2322_v59, %v2542_v27 }
 0x39a   : > { %v690_v5 = vmul.f32 %v2324_v60, %v2538_v19 }
 0x39b   : > { %v2326_v61 = vpop.eup %2325 }
 0x39c   : > { %v679_v63 = vpop.xlane.xlu0 %678  ;;  %v689_v1 = vmul.f32 %v2326_v61, %v2310_v39  ;;  %v697_v10 = vpack.c.bf16 %v691_v62, %v690_v5 }
 0x39d   : > { %2327 = vrcp.f32 %v679_v63 }
 0x39e   : > { %v696_v9 = vpack.c.bf16 %v689_v1, %v688_v0  ;;  %2329 = vrcp.f32 %v670_v58 }
 0x39f   : > { %2331 = vrcp.f32 %v676_v56 }
 0x3a0   : > { %2186 = vmatprep.mubr.msk.bf16.mxu0 %vm607_vm2, %v696_v9  ;;  %v808_v13 = vpop.permute.xlu0 %807 }
 0x3a1   : > { %2187 = vmatmul.mubr.msk.bf16.vlgmr.msra.gmra.mrb[8].mxu0 %vm607_vm2, %v697_v10  ;;  %v829_v15 = vsel %vm517_vm1, %v808_v13, 0 }
 0x3a2   : > { %2195 = vmatpush3.bf16.xpose.msra.mxu0 %v826_v14 }
 0x3a3   : > { %2275 = vmatprep.subr.msk.bf16.mxu0 %vm517_vm1, %v808_v13 }
 0x3a4   : > { %v798_v35 = vpop.permute.xlu0 %797 }
 0x3a7   : > { %v2328_v21 = vpop.eup %2327 }
 0x3a8   : > { %v2330_v22 = vpop.eup %2329  ;;  %v695_v27 = vmul.f32 %v2328_v21, %v2557_v46  ;;  %v802_v37 = vpop.permute.xlu0 %801 }
 0x3a9   : > { %v2332_v25 = vpop.eup %2331  ;;  %v692_v28 = vmul.f32 %v2330_v22, %v2553_v44 }
 0x3aa   : > { %2197 = vmatpush3.bf16.xpose.msra.mxu0 %v829_v15  ;;  %v694_v30 = vmul.f32 %v2332_v25, %v2548_v41 }
 0x3ab   : > { %2276 = vmatprep.subr.msk.bf16.mxu0 %vm517_vm1, %v810_v16 }
 0x3ac   : > { %v699_v32 = vpack.c.bf16 %v695_v27, %v694_v30 }
 0x3b2   : > { %2199 = vmatpush3.bf16.xpose.msra.mxu0 %v832_v17 }
 0x3bd   : > { %v673_v18 = vpop.xlane.xlu1 %672 }
 0x3be   : > { %2333 = vrcp.f32 %v673_v18 }
 0x3c1   : > { %v812_v19 = vpop.permute.xlu1 %811 }
 0x3c2   : > { %v835_v20 = vsel %vm517_vm1, %v812_v19, 0  ;;  %2277 = vmatprep.subr.msk.bf16.mxu0 %vm517_vm1, %v812_v19 }
 0x3c3   : > { %2201 = vmatpush3.bf16.xpose.msra.mxu0 %v835_v20 }
 0x3c5   : > { %v800_v36 = vpop.permute.xlu1 %799 }
 0x3c8   : > { %v2334_v26 = vpop.eup %2333 }
 0x3c9   : > { %v693_v29 = vmul.f32 %v2334_v26, %v2318_v50  ;;  %v804_v38 = vpop.permute.xlu1 %803 }
 0x3cb   : > { %v698_v31 = vpack.c.bf16 %v693_v29, %v692_v28 }
 0x3cd   : > { %2190 = vmatprep.mubr.msk.bf16.mxu0 %vm607_vm2, %v698_v31 }
 0x3ce   : > { %2191 = vmatmul.mubr.msk.bf16.gmra.mrb[12].mxu0 %vm607_vm2, %v699_v32 }
 0x3cf   : > { %2202 = vmatprep.mubr.msk.bf16.mxu0 %vm517_vm1, %v798_v35 }
 0x3d6   : > { %2203 = vmatmul.mubr.msk.bf16.vlgmr.msra.gmra.mrb[16].mxu0 %vm517_vm1, %v800_v36 }
 0x3d7   : > { %2206 = vmatprep.mubr.msk.bf16.mxu0 %vm517_vm1, %v802_v37 }
 0x3de   : > { %2207 = vmatmul.mubr.msk.bf16.gmra.mrb[20].mxu0 %vm517_vm1, %v804_v38 }
 0x474   : > { %v2188_v39 = vpop.f32.mrb[8].mxu0 }
 0x475   : > { %791 = vst.msk [vmem:[#allocation2 + $0x10] sm:$0xff] %vm3333_vm0, %v2188_v39  ;;  %v758_v40 = vpop.f32.mrb[9].mxu0 }
 0x476   : > { %789 = vst.msk [vmem:[#allocation2] sm:$0xff] %vm3333_vm0, %v758_v40  ;;  %v2189_v41 = vpop.f32.mrb[10].mxu0 }
 0x477   : > { %792 = vst.msk [vmem:[#allocation2 + $0x18] sm:$0xff] %vm3333_vm0, %v2189_v41  ;;  %v761_v42 = vpop.f32.mrb[11].mxu0 }
 0x478   : > { %790 = vst.msk [vmem:[#allocation2 + $0x8] sm:$0xff] %vm3333_vm0, %v761_v42 }
 0x4a1   : > { %v2192_v43 = vpop.f32.mrb[12].mxu0 }
 0x4a2   : > { %795 = vst.msk [vmem:[#allocation2 + $0x30] sm:$0xff] %vm3333_vm0, %v2192_v43  ;;  %v774_v44 = vpop.f32.mrb[13].mxu0 }
 0x4a3   : > { %793 = vst.msk [vmem:[#allocation2 + $0x20] sm:$0xff] %vm3333_vm0, %v774_v44  ;;  %v2193_v45 = vpop.f32.mrb[14].mxu0 }
 0x4a4   : > { %796 = vst.msk [vmem:[#allocation2 + $0x38] sm:$0xff] %vm3333_vm0, %v2193_v45  ;;  %v777_v46 = vpop.f32.mrb[15].mxu0 }
 0x4a5   : > { %794 = vst.msk [vmem:[#allocation2 + $0x28] sm:$0xff] %vm3333_vm0, %v777_v46 }
 0x4a9   : > { %v2204_v47 = vpop.f32.mrb[16].mxu0 }
 0x4aa   : > { %v871_v48 = vpop.f32.mrb[17].mxu0  ;;  %v908_v53 = vsel %vm607_vm2, %v2204_v47, -inf }
 0x4ab   : > { %v2205_v49 = vpop.f32.mrb[18].mxu0  ;;  %v902_v50 = vsel %vm607_vm2, %v871_v48, -inf }
 0x4ac   : > { %903 = vmax.xlane.f32.xlu0 %v902_v50  ;;  %v874_v51 = vpop.f32.mrb[19].mxu0  ;;  %v911_v57 = vsel %vm607_vm2, %v2205_v49, -inf }
 0x4ad   : > { %v905_v52 = vsel %vm607_vm2, %v874_v51, -inf }
 0x4ae   : > { %906 = vmax.xlane.f32.xlu1 %v905_v52 }
 0x4b0   : > { %909 = vmax.xlane.f32.xlu0 %v908_v53 }
 0x4b1   : > { %v2208_v54 = vpop.f32.mrb[20].mxu0 }
 0x4b2   : > { %v887_v55 = vpop.f32.mrb[21].mxu0  ;;  %v920_v60 = vsel %vm607_vm2, %v2208_v54, -inf }
 0x4b3   : > { %v2209_v56 = vpop.f32.mrb[22].mxu0  ;;  %v914_v58 = vsel %vm607_vm2, %v887_v55, -inf }
 0x4b4   : > { %912 = vmax.xlane.f32.xlu0 %v911_v57  ;;  %915 = vmax.xlane.f32.xlu1 %v914_v58  ;;  %v890_v59 = vpop.f32.mrb[23].mxu0  ;;  %v923_v62 = vsel %vm607_vm2, %v2209_v56, -inf }
 0x4b5   : > { %v917_v61 = vsel %vm607_vm2, %v890_v59, -inf }
 0x4b8   : > { %921 = vmax.xlane.f32.xlu1 %v920_v60  ;;  %918 = vmax.xlane.f32.xlu0 %v917_v61 }
 0x4bc   : > { %924 = vmax.xlane.f32.xlu0 %v923_v62 }
 0x4c9   : > { %994 = vrot.lane.b32.xlu1 %v2495_v24, %s2379_s14 }
 0x539   : > { %v904_v63 = vpop.xlane.xlu0 %903 }
 0x53a   : > { %v926_v0 = vsub.f32 %v871_v48, %v904_v63 }
 0x53b   : > { %v907_v1 = vpop.xlane.xlu1 %906 }
 0x53c   : > { %v934_v10 = vmul.f32 1.442695, %v926_v0  ;;  %v927_v14 = vsub.f32 %v874_v51, %v907_v1 }
 0x53d   : > { %v910_v5 = vpop.xlane.xlu0 %909 }
 0x53e   : > { %v928_v9 = vsub.f32 %v2204_v47, %v910_v5  ;;  %v936_v20 = vmul.f32 1.442695, %v927_v14 }
 0x540   : > { %v938_v13 = vmul.f32 1.442695, %v928_v9 }
 0x541   : > { %v916_v15 = vpop.xlane.xlu1 %915  ;;  %v913_v16 = vpop.xlane.xlu0 %912 }
 0x542   : > { %2335 = vpow2.f32 %v938_v13  ;;  %v929_v17 = vsub.f32 %v2205_v49, %v913_v16  ;;  %v930_v18 = vsub.f32 %v887_v55, %v916_v15 }
 0x543   : > { %2337 = vpow2.f32 %v934_v10 }
 0x544   : > { %v940_v19 = vmul.f32 1.442695, %v929_v17  ;;  %v942_v24 = vmul.f32 1.442695, %v930_v18 }
 0x545   : > { %v922_v21 = vpop.xlane.xlu1 %921  ;;  %v919_v22 = vpop.xlane.xlu0 %918 }
 0x546   : > { %v932_v25 = vsub.f32 %v2208_v54, %v922_v21  ;;  %2339 = vpow2.f32 %v940_v19  ;;  %v931_v27 = vsub.f32 %v890_v59, %v919_v22 }
 0x547   : > { %2341 = vpow2.f32 %v936_v20 }
 0x548   : > { %v946_v26 = vmul.f32 1.442695, %v932_v25  ;;  %v944_v35 = vmul.f32 1.442695, %v931_v27  ;;  %v2293_v25 = vld [vmem:[%s3312_s3] sm:$0xff]  }
 0x549   : > { %v995_v28 = vpop.permute.xlu1 %994  ;;  %v925_v29 = vpop.xlane.xlu0 %924 }
 0x54a   : > { %2343 = vpow2.f32 %v946_v26  ;;  %v933_v30 = vsub.f32 %v2209_v56, %v925_v29  ;;  %2210 = vmatprep.subr.bf16.mxu1 %v995_v28  ;;  %v2295_v26 = vld [vmem:[%s3312_s3 + $0x10] sm:$0xff]   ;;  %v2296_v29 = vld [vmem:[%s3312_s3 + $0x18] sm:$0xff]  }
 0x54b   : > { %2211 = vmatpush3.bf16.msra.mxu1 %v995_v28  ;;  %2345 = vpow2.f32 %v942_v24  ;;  %v2294_v24 = vld [vmem:[%s3312_s3 + $0x8] sm:$0xff]  }
 0x54c   : > { %v2611_v31 = vpop.eup %2335  ;;  %v948_v32 = vmul.f32 1.442695, %v933_v30 }
 0x54d   : > { %v956_v36 = vsel %vm607_vm2, %v2611_v31, 0.0  ;;  %v2338_v37 = vpop.eup %2337 }
 0x54e   : > { %2347 = vpow2.f32 %v948_v32  ;;  %957 = vadd.xlane.f32.xlu1 %v956_v36  ;;  %v950_v39 = vsel %vm607_vm2, %v2338_v37, 0.0 }
 0x54f   : > { %2349 = vpow2.f32 %v944_v35 }
 0x550   : > { %v2340_v38 = vpop.eup %2339 }
 0x551   : > { %v959_v40 = vsel %vm607_vm2, %v2340_v38, 0.0  ;;  %v2342_v41 = vpop.eup %2341 }
 0x552   : > { %951 = vadd.xlane.f32.xlu1 %v950_v39  ;;  %960 = vadd.xlane.f32.xlu0 %v959_v40  ;;  %v953_v45 = vsel %vm607_vm2, %v2342_v41, 0.0 }
 0x554   : > { %v2617_v42 = vpop.eup %2343 }
 0x555   : > { %v968_v43 = vsel %vm607_vm2, %v2617_v42, 0.0  ;;  %v2346_v44 = vpop.eup %2345 }
 0x556   : > { %969 = vadd.xlane.f32.xlu1 %v968_v43  ;;  %954 = vadd.xlane.f32.xlu0 %v953_v45  ;;  %v962_v47 = vsel %vm607_vm2, %v2346_v44, 0.0 }
 0x558   : > { %v2348_v46 = vpop.eup %2347 }
 0x559   : > { %v971_v48 = vsel %vm607_vm2, %v2348_v46, 0.0  ;;  %v2350_v49 = vpop.eup %2349 }
 0x55a   : > { %963 = vadd.xlane.f32.xlu1 %v962_v47  ;;  %972 = vadd.xlane.f32.xlu0 %v971_v48  ;;  %v965_v50 = vsel %vm607_vm2, %v2350_v49, 0.0 }
 0x55e   : > { %966 = vadd.xlane.f32.xlu0 %v965_v50 }
 0x56b   : > { %998 = vrot.lane.b32.xlu1 %v2503_v34, %s2379_s14 }
 0x56f   : > { %1000 = vrot.lane.b32.xlu1 %v2501_v33, %s2379_s14 }
 0x574   : > { %996 = vrot.lane.b32.xlu0 %v2493_v23, %s2379_s14 }
 0x5db   : > { %v958_v51 = vpop.xlane.xlu1 %957 }
 0x5df   : > { %v952_v52 = vpop.xlane.xlu1 %951  ;;  %v961_v53 = vpop.xlane.xlu0 %960 }
 0x5e0   : > { %2351 = vrcp.f32 %v952_v52 }
 0x5e3   : > { %v970_v54 = vpop.xlane.xlu1 %969  ;;  %v955_v55 = vpop.xlane.xlu0 %954 }
 0x5e4   : > { %2353 = vrcp.f32 %v955_v55 }
 0x5e5   : > { %2355 = vrcp.f32 %v961_v53 }
 0x5e6   : > { %2357 = vrcp.f32 %v958_v51 }
 0x5e7   : > { %v973_v56 = vpop.xlane.xlu0 %972  ;;  %v964_v57 = vpop.xlane.xlu1 %963 }
 0x5e8   : > { %2359 = vrcp.f32 %v964_v57 }
 0x5ea   : > { %v2352_v34 = vpop.eup %2351 }
 0x5eb   : > { %v967_v58 = vpop.xlane.xlu0 %966  ;;  %v999_v33 = vpop.permute.xlu1 %998  ;;  %v982_v61 = vmul.f32 %v2352_v34, %v2338_v37 }
 0x5ec   : > { %2361 = vrcp.f32 %v967_v58 }
 0x5ed   : > { %2363 = vrcp.f32 %v973_v56 }
 0x5ee   : > { %v2354_v59 = vpop.eup %2353  ;;  %2365 = vrcp.f32 %v970_v54 }
 0x5ef   : > { %v997_v60 = vpop.permute.xlu0 %996  ;;  %v983_v23 = vmul.f32 %v2354_v59, %v2342_v41  ;;  %v2356_v63 = vpop.eup %2355 }
 0x5f0   : > { %2212 = vmatprep.subr.bf16.mxu1 %v997_v60  ;;  %v2358_v0 = vpop.eup %2357  ;;  %v1001_v5 = vpop.permute.xlu1 %1000  ;;  %v985_v10 = vmul.f32 %v2356_v63, %v2340_v38  ;;  %v2297_v38 = vld [vmem:[%s3314_s5] sm:$0xff]  }
 0x5f1   : > { %2213 = vmatpush3.bf16.msra.mxu1 %v997_v60  ;;  %v990_v62 = vpack.c.bf16 %v983_v23, %v982_v61  ;;  %v984_v14 = vmul.f32 %v2358_v0, %v2611_v31  ;;  %2242 = vmatprep.subr.bf16.mxu0 %v2297_v38  ;;  %v2298_v0 = vld [vmem:[%s3314_s5 + $0x8] sm:$0xff]  }
 0x5f2   : > { %2214 = vmatprep.subr.bf16.mxu1 %v999_v33  ;;  %v2360_v1 = vpop.eup %2359  ;;  %2243 = vmatpush3.bf16.msra.mxu0 %v2297_v38 }
 0x5f3   : > { %2218 = vmatprep.mubr.msk.bf16.mxu1 %vm607_vm2, %v990_v62  ;;  %v986_v15 = vmul.f32 %v2360_v1, %v2346_v44  ;;  %v991_v16 = vpack.c.bf16 %v985_v10, %v984_v14  ;;  %2244 = vmatprep.subr.bf16.mxu0 %v2298_v0  ;;  %v2059_v1 = vld [vmem:[%s3313_s4] ss:$0 sm:$0xff] }
 0x5f5   : > { %2215 = vmatpush3.bf16.msra.mxu1 %v999_v33 }
 0x5f6   : > { %v2362_v9 = vpop.eup %2361  ;;  %2216 = vmatprep.subr.bf16.mxu1 %v1001_v5  ;;  %2245 = vmatpush3.bf16.msra.mxu0 %v2298_v0 }
 0x5f7   : > { %v987_v13 = vmul.f32 %v2362_v9, %v2350_v49  ;;  %v2364_v17 = vpop.eup %2363 }
 0x5f8   : > { %v2366_v19 = vpop.eup %2365  ;;  %v989_v20 = vmul.f32 %v2364_v17, %v2348_v46 }
 0x5f9   : > { %2217 = vmatpush3.bf16.msra.mxu1 %v1001_v5  ;;  %v992_v18 = vpack.c.bf16 %v987_v13, %v986_v15  ;;  %v988_v21 = vmul.f32 %v2366_v19, %v2617_v42 }
 0x5fa   : > { %2226 = vmatprep.subr.bf16.mxu1 %v2293_v25 }
 0x5fb   : > { %v993_v22 = vpack.c.bf16 %v989_v20, %v988_v21 }
 0x5fc   : > { %2219 = vmatmul.mubr.msk.bf16.vlgmr.msra.gmra.mrb[8].mxu1 %vm607_vm2, %v991_v16 }
 0x5fd   : > { %2222 = vmatprep.mubr.msk.bf16.mxu1 %vm607_vm2, %v992_v18  ;;  %2227 = vmatpush3.bf16.msra.mxu1 %v2293_v25 }
 0x5fe   : > { %2228 = vmatprep.subr.bf16.mxu1 %v2294_v24 }
 0x601   : > { %2229 = vmatpush3.bf16.msra.mxu1 %v2294_v24 }
 0x602   : > { %2230 = vmatprep.subr.bf16.mxu1 %v2295_v26 }
 0x604   : > { %2223 = vmatmul.mubr.msk.bf16.gmra.mrb[12].mxu1 %vm607_vm2, %v993_v22 }
 0x605   : > { %2231 = vmatpush3.bf16.msra.mxu1 %v2295_v26 }
 0x606   : > { %2232 = vmatprep.subr.bf16.mxu1 %v2296_v29 }
 0x609   : > { %2233 = vmatpush3.bf16.msra.mxu1 %v2296_v29 }
 0x6cf   : > { %v2220_v27 = vpop.f32.mrb[8].mxu1 }
 0x6d0   : > { %v1052_v28 = vpop.f32.mrb[9].mxu1 }
 0x6d1   : > { %1091 = vrot.lane.b32.xlu0 %v1052_v28, %s2379_s14  ;;  %v2221_v30 = vpop.f32.mrb[10].mxu1 }
 0x6d2   : > { %v1055_v31 = vpop.f32.mrb[11].mxu1 }
 0x6d3   : > { %1093 = vrot.lane.b32.xlu1 %v1055_v31, %s2379_s14 }
 0x6d5   : > { %1095 = vrot.lane.b32.xlu0 %v2220_v27, %s2379_s14 }
 0x6d7   : > { %1097 = vrot.lane.b32.xlu1 %v2221_v30, %s2379_s14  ;;  %v2224_v32 = vpop.f32.mrb[12].mxu1 }
 0x6d8   : > { %v1068_v35 = vpop.f32.mrb[13].mxu1 }
 0x6d9   : > { %1099 = vrot.lane.b32.xlu0 %v1068_v35, %s2379_s14  ;;  %v2225_v36 = vpop.f32.mrb[14].mxu1 }
 0x6da   : > { %v1071_v37 = vpop.f32.mrb[15].mxu1 }
 0x6db   : > { %1101 = vrot.lane.b32.xlu1 %v1071_v37, %s2379_s14  ;;  %v1374_v37 = vlaneseq }
 0x6dd   : > { %1103 = vrot.lane.b32.xlu0 %v2224_v32, %s2379_s14  ;;  %v2726_v38 = vshrl.u32 %v1374_v37, 7 }
 0x6df   : > { %1105 = vrot.lane.b32.xlu1 %v2225_v36, %s2379_s14  ;;  %vm1531_vm4 = vcmp.lt.s32.totalorder %v2726_v38, 1  ;;  %vm1612_vm5 = vcmp.lt.s32.totalorder %v2726_v38, 7  ;;  %v2772_v0 = vadd.s32 56, %v2726_v38 }
 0x743   : > { %v1092_v39 = vpop.permute.xlu0 %1091 }
 0x744   : > { %1116 = vst.msk [vmem:[#allocation2] sm:$0xff] %vm1115_vm3, %v1092_v39  ;;  %v1558_v39 = vsub.s32 0, %v2726_v38 }
 0x745   : > { %v1094_v40 = vpop.permute.xlu1 %1093 }
 0x746   : > { %1117 = vst.msk [vmem:[#allocation2 + $0x8] sm:$0xff] %vm1115_vm3, %v1094_v40  ;;  %v1372_v40 = vld [vmem:[%s3316_s7] sm:$0xff] }
 0x747   : > { %v1096_v41 = vpop.permute.xlu0 %1095 }
 0x748   : > { %1118 = vst.msk [vmem:[#allocation2 + $0x10] sm:$0xff] %vm1115_vm3, %v1096_v41  ;;  %v1513_v41 = vsub.s32 4, %v2726_v38 }
 0x749   : > { %v1098_v42 = vpop.permute.xlu1 %1097 }
 0x74a   : > { %1119 = vst.msk [vmem:[#allocation2 + $0x18] sm:$0xff] %vm1115_vm3, %v1098_v42  ;;  %v1586_v42 = vsub.s32 1, %v2726_v38 }
 0x74b   : > { %v1100_v43 = vpop.permute.xlu0 %1099  ;;  %v1124_v44 = vld [vmem:[#allocation2] sm:$0xff] }
 0x74c   : > { %1120 = vst.msk [vmem:[#allocation2 + $0x20] sm:$0xff] %vm1115_vm3, %v1100_v43  ;;  %v1132_v47 = vmax.f32 %v1124_v44, 0.0  ;;  %v1639_v43 = vsub.s32 2, %v2726_v38  ;;  %v1759_v44 = vsub.s32 7, %v2726_v38 }
 0x74d   : > { %v1102_v45 = vpop.permute.xlu1 %1101  ;;  %v1125_v46 = vld [vmem:[#allocation2 + $0x8] sm:$0xff] }
 0x74e   : > { %1121 = vst.msk [vmem:[#allocation2 + $0x28] sm:$0xff] %vm1115_vm3, %v1102_v45  ;;  %v1133_v48 = vmax.f32 %v1125_v46, 0.0  ;;  %v2736_v45 = vrot.slane %v1372_v40, %v1558_v39  ;;  %v1377_v46 = vadd.s32 16, %v2726_v38 }
 0x74f   : > { %v1104_v49 = vpop.permute.xlu0 %1103  ;;  %v1126_v50 = vld [vmem:[#allocation2 + $0x10] sm:$0xff] }
 0x750   : > { %1122 = vst.msk [vmem:[#allocation2 + $0x30] sm:$0xff] %vm1115_vm3, %v1104_v49  ;;  %v1140_v51 = vpack.c.bf16 %v1133_v48, %v1132_v47  ;;  %v1134_v54 = vmax.f32 %v1126_v50, 0.0  ;;  %v1378_v47 = vadd.s32 24, %v2726_v38  ;;  %v2740_v48 = vrot.slane %v1372_v40, %v1513_v41 }
 0x751   : > { %v1106_v52 = vpop.permute.xlu1 %1105  ;;  %v1127_v53 = vld [vmem:[#allocation2 + $0x18] sm:$0xff]  ;;  %v2742_v49 = vrot.slane %v1372_v40, %v1586_v42  ;;  %v2744_v50 = vrot.slane %v1372_v40, %v1639_v43 }
 0x752   : > { %1123 = vst.msk [vmem:[#allocation2 + $0x38] sm:$0xff] %vm1115_vm3, %v1106_v52  ;;  %2234 = vmatprep.mubr.msk.bf16.mxu1 %vm607_vm2, %v1140_v51  ;;  %v1135_v55 = vmax.f32 %v1127_v53, 0.0  ;;  %v2747_v51 = vadd.s32 32, %v2726_v38  ;;  %v2749_v52 = vrot.slane %v1372_v40, %v1759_v44  ;;  %v1560_v53 = vmul.f32 0.0, %v2736_v45 }
 0x753   : > { %v1128_v56 = vld [vmem:[#allocation2 + $0x20] sm:$0xff] }
 0x754   : > { %v1141_v57 = vpack.c.bf16 %v1135_v55, %v1134_v54  ;;  %v1136_v34 = vmax.f32 %v1128_v56, 0.0  ;;  %3347 = vst [vmem:[#allocation11_spill] sm:$0xff] %v2749_v52  ;;  %v1401_v54 = vand.u32 7, %v1377_v46  ;;  %v1408_v55 = vand.u32 7, %v1378_v47  ;;  %v2755_v56 = vld [vmem:[%s3315_s6] ss:$0 sm:$0xff] }
 0x755   : > { %v1129_v58 = vld [vmem:[#allocation2 + $0x28] sm:$0xff] }
 0x756   : > { %2235 = vmatmul.mubr.msk.bf16.vlgmr.msra.gmra.mrb[16].mxu1 %vm607_vm2, %v1141_v57  ;;  %v1137_v59 = vmax.f32 %v1129_v58, 0.0  ;;  %v1588_v57 = vmul.f32 0.0, %v2742_v49  ;;  %v1667_v58 = vsub.s32 3, %v2726_v38  ;;  %vm2781_vm6 = vcmp.ne.s32.totalorder %v1401_v54, 0 }
 0x757   : > { %v1130_v33 = vld [vmem:[#allocation2 + $0x30] sm:$0xff]  ;;  %vm2785_vm7 = vcmp.ne.s32.totalorder %v1408_v55, 0  ;;  %vm2789_vm8 = vcmp.ne.s32.totalorder %v1401_v54, 7  ;;  %vm2793_vm9 = vcmp.ne.s32.totalorder %v1408_v55, 7 }
 0x758   : > { %v1142_v60 = vpack.c.bf16 %v1137_v59, %v1136_v34  ;;  %v1138_v23 = vmax.f32 %v1130_v33, 0.0  ;;  %v1695_v34 = vsub.s32 5, %v2726_v38  ;;  %v1731_v59 = vsub.s32 6, %v2726_v38 }
 0x759   : > { %v1131_v61 = vld [vmem:[#allocation2 + $0x38] sm:$0xff] }
 0x75a   : > { %2238 = vmatprep.mubr.msk.bf16.mxu1 %vm607_vm2, %v1142_v60  ;;  %v1139_v62 = vmax.f32 %v1131_v61, 0.0  ;;  %v2764_v60 = vadd.s32 8, %v2726_v38  ;;  %v2767_v61 = vadd.s32 48, %v2726_v38 }
 0x75c   : > { %v1143_v63 = vpack.c.bf16 %v1139_v62, %v1138_v23  ;;  %v1641_v62 = vmul.f32 0.0, %v2744_v50 }
 0x75e   : > { %2239 = vmatmul.mubr.msk.bf16.gmra.mrb[20].mxu1 %vm607_vm2, %v1143_v63  ;;  %v3321_v63 = vand.u32 7, %v2747_v51 }
 0x760   : > { %vm2814_vm10 = vcmp.ne.s32.totalorder %v3321_v63, 0 }
 0x829   : > { %v2236_v5 = vpop.f32.mrb[16].mxu1 }
 0x82a   : > { %v1229_v9 = vpop.f32.mrb[17].mxu1  ;;  %v1238_v14 = vadd.f32 %v2236_v5, %v2059_v1 }
 0x82b   : > { %v1230_v10 = vadd.f32 %v2059_v1, %v1229_v9  ;;  %v2237_v13 = vpop.f32.mrb[18].mxu1 }
 0x82c   : > { %v1241_v15 = vadd.f32 %v2237_v13, %v2059_v1  ;;  %v1232_v16 = vpop.f32.mrb[19].mxu1  ;;  %v2688_v21 = vadd.f32 %v1238_v14, %v2466_v4 }
 0x82d   : > { %v1233_v17 = vadd.f32 %v2059_v1, %v1232_v16  ;;  %v2682_v19 = vadd.f32 %v1230_v10, %v2462_v2 }
 0x82e   : > { %v2679_v18 = vadd.f32 %v1241_v15, %v2470_v6  ;;  %3342 = vst [vmem:[#allocation6_spill] sm:$0xff] %v2688_v21 }
 0x82f   : > { %3340 = vst [vmem:[#allocation4_spill] sm:$0xff] %v2682_v19  ;;  %v2685_v20 = vadd.f32 %v1233_v17, %v2464_v3  ;;  %v2797_v17 = vrot.slane %v1372_v40, %v1667_v58 }
 0x830   : > { %3339 = vst [vmem:[#allocation3_spill] sm:$0xff] %v2679_v18  ;;  %v1269_v24 = vpack.c.bf16 %v2679_v18, %v2688_v21 }
 0x831   : > { %3341 = vst [vmem:[#allocation5_spill] sm:$0xff] %v2685_v20  ;;  %v1268_v22 = vpack.c.bf16 %v2685_v20, %v2682_v19  ;;  %v2240_v25 = vpop.f32.mrb[20].mxu1 }
 0x832   : > { %v1245_v26 = vpop.f32.mrb[21].mxu1  ;;  %v1254_v2 = vadd.f32 %v2240_v25, %v2059_v1  ;;  %v2801_v25 = vrot.slane %v1372_v40, %v1731_v59 }
 0x833   : > { %v1246_v27 = vadd.f32 %v2059_v1, %v1245_v26  ;;  %v2241_v6 = vpop.f32.mrb[22].mxu1  ;;  %2246 = vmatprep.mubr.msk.bf16.mxu0 %vm3333_vm0, %v1268_v22  ;;  %v2799_v22 = vrot.slane %v1372_v40, %v1695_v34 }
 0x834   : > { %v1257_v28 = vadd.f32 %v2241_v6, %v2059_v1  ;;  %v1248_v29 = vpop.f32.mrb[23].mxu1  ;;  %2247 = vmatmul.mubr.msk.bf16.vlgmr.msra.gmra.mrb[24].mxu0 %vm3333_vm0, %v1269_v24  ;;  %v2706_v32 = vadd.f32 %v1254_v2, %v2481_v11  ;;  %v2301_v11 = vld [vmem:[%s3318_s9 + $0x10] sm:$0xff]  }
 0x835   : > { %v1249_v3 = vadd.f32 %v2059_v1, %v1248_v29  ;;  %v2700_v30 = vadd.f32 %v1246_v27, %v2472_v7  ;;  %v2299_v7 = vld [vmem:[%s3318_s9] sm:$0xff]   ;;  %v2775_v1 = vadd.s32 40, %v2726_v38 }
 0x836   : > { %v2697_v4 = vadd.f32 %v1257_v28, %v2483_v12  ;;  %3346 = vst [vmem:[#allocation10_spill] sm:$0xff] %v2706_v32  ;;  %2254 = vmatprep.subr.bf16.mxu1 %v2299_v7  ;;  %v2302_v12 = vld [vmem:[%s3318_s9 + $0x18] sm:$0xff]  }
 0x837   : > { %3344 = vst [vmem:[#allocation8_spill] sm:$0xff] %v2700_v30  ;;  %v2703_v31 = vadd.f32 %v1249_v3, %v2474_v8  ;;  %v2300_v8 = vld [vmem:[%s3318_s9 + $0x8] sm:$0xff]   ;;  %2255 = vmatpush3.bf16.msra.mxu1 %v2299_v7 }
 0x838   : > { %3343 = vst [vmem:[#allocation7_spill] sm:$0xff] %v2697_v4  ;;  %v1271_v36 = vpack.c.bf16 %v2697_v4, %v2706_v32  ;;  %2256 = vmatprep.subr.bf16.mxu1 %v2300_v8 }
 0x839   : > { %3345 = vst [vmem:[#allocation9_spill] sm:$0xff] %v2703_v31  ;;  %v1270_v35 = vpack.c.bf16 %v2703_v31, %v2700_v30 }
 0x83b   : > { %2250 = vmatprep.mubr.msk.bf16.mxu0 %vm3333_vm0, %v1270_v35  ;;  %2257 = vmatpush3.bf16.msra.mxu1 %v2300_v8  ;;  %v1436_v35 = vand.u32 7, %v2772_v0 }
 0x83c   : > { %2251 = vmatmul.mubr.msk.bf16.gmra.mrb[28].mxu0 %vm3333_vm0, %v1271_v36  ;;  %2258 = vmatprep.subr.bf16.mxu1 %v2301_v11 }
 0x83d   : > { %vm2932_vm13 = vcmp.ne.s32.totalorder %v1436_v35, 0  ;;  %vm2936_vm14 = vcmp.ne.s32.totalorder %v1436_v35, 7 }
 0x83f   : > { %2259 = vmatpush3.bf16.msra.mxu1 %v2301_v11 }
 0x840   : > { %2260 = vmatprep.subr.bf16.mxu1 %v2302_v12 }
 0x843   : > { %2261 = vmatpush3.bf16.msra.mxu1 %v2302_v12 }
 0x907   : > { %v2248_v33 = vpop.f32.mrb[24].mxu0 }
 0x908   : > { %v1341_v23 = vpop.f32.mrb[25].mxu0  ;;  %v1350_v5 = vadd.f32 %v2248_v33, %v2755_v56 }
 0x909   : > { %v2779_v9 = vadd.f32 %v2755_v56, %v1341_v23  ;;  %v2249_v10 = vpop.f32.mrb[26].mxu0 }
 0x90a   : > { %v1344_v24 = vpop.f32.mrb[27].mxu0  ;;  %v2809_v28 = vadd.f32 %v2249_v10, %v2755_v56  ;;  %v1517_v7 = vmul.f32 %v2740_v48, %v1350_v5  ;;  %v1525_v8 = vrot.slane %v1350_v5, 7  ;;  %v1591_v11 = vmul.f32 %v2742_v49, %v1350_v5 }
 0x90b   : > { %v1515_v26 = vmul.f32 %v2740_v48, %v2779_v9  ;;  %v1345_v29 = vadd.f32 %v2755_v56, %v1344_v24  ;;  %v1606_v37 = vrot.slane %v1350_v5, 1  ;;  %v2823_v39 = vmul.f32 %v2749_v52, %v1350_v5 }
 0x90c   : > { %v3323_v40 = vrot.slane %v2809_v28, 7  ;;  %v3322_v41 = vrot.slane %v2809_v28, 1  ;;  %v3324_v42 = vrot.slane %v2779_v9, 7  ;;  %v2830_v43 = vmul.f32 %v2742_v49, %v2779_v9 }
 0x90d   : > { %v1568_v12 = vadd.f32 %v1560_v53, %v1515_v26  ;;  %v1524_v46 = vrot.slane %v1345_v29, 7  ;;  %v3327_v54 = vrot.slane %v2779_v9, 1  ;;  %v1605_v58 = vrot.slane %v1345_v29, 1 }
 0x90e   : > { %v1536_v53 = vsel %vm1531_vm4, %v1525_v8, %v3323_v40  ;;  %v2841_v55 = vsel %vm1612_vm5, %v1606_v37, %v3322_v41  ;;  %v1592_v59 = vmul.f32 %v2742_v49, %v2809_v28  ;;  %v2849_v33 = vmul.f32 %v2749_v52, %v2809_v28 }
 0x90f   : > { %v1596_v44 = vadd.f32 %v1588_v57, %v1568_v12  ;;  %v2252_v47 = vpop.f32.mrb[28].mxu0  ;;  %v1518_v57 = vmul.f32 %v2740_v48, %v2809_v28  ;;  %v2852_v23 = vmul.f32 %v2740_v48, %v1345_v29  ;;  %v1632_v10 = vsel %vm2793_vm9, %v2841_v55, 0.0 }
 0x910   : > { %v1357_v34 = vpop.f32.mrb[29].mxu0  ;;  %v1660_v24 = vsel %vm2785_vm7, %v1536_v53, 0.0  ;;  %v1590_v26 = vmul.f32 %v2742_v49, %v1345_v29  ;;  %v1687_v63 = vsel %vm2789_vm8, %v2841_v55, 0.0  ;;  %v2869_v36 = vsel %vm1531_vm4, %v1524_v46, %v1525_v8 }
 0x911   : > { %v2253_v0 = vpop.f32.mrb[30].mxu0  ;;  %v2854_v5 = vadd.f32 %v1641_v62, %v1596_v44  ;;  %v2875_v62 = vsel %vm1531_vm4, %v3324_v42, %v1524_v46  ;;  %v2879_v44 = vsel %vm1612_vm5, %v1605_v58, %v1606_v37  ;;  %v1723_v41 = vsel %vm2781_vm6, %v1536_v53, 0.0 }
 0x912   : > { %v2862_v12 = vpop.f32.mrb[31].mxu0  ;;  %v1550_v40 = vsel %vm2781_vm6, %v2875_v62, 0.0  ;;  %v1551_v8 = vsel %vm2785_vm7, %v2869_v36, 0.0  ;;  %v2893_v46 = vsel %vm1612_vm5, %v3327_v54, %v1605_v58  ;;  %v1631_v2 = vsel %vm2789_vm8, %v2879_v44, 0.0 }
 0x913   : > { %v1562_v37 = vmul.f32 %v2736_v45, %v1550_v40  ;;  %v1563_v42 = vmul.f32 %v2736_v45, %v1551_v8  ;;  %v1659_v6 = vsel %vm2781_vm6, %v2869_v36, 0.0  ;;  %v1644_v27 = vmul.f32 %v2744_v50, %v1632_v10 }
 0x914   : > { %v1672_v31 = vmul.f32 %v2797_v17, %v1660_v24  ;;  %v2906_v4 = vadd.f32 %v2252_v47, %v2755_v56  ;;  %v2909_v58 = vadd.f32 %v2755_v56, %v1357_v34  ;;  %v1699_v40 = vmul.f32 %v2799_v22, %v1687_v63 }
 0x915   : > { %v1570_v8 = vadd.f32 %v1562_v37, %v1517_v7  ;;  %v1571_v54 = vadd.f32 %v1563_v42, %v1518_v57  ;;  %v1552_v30 = vsel %vm2814_vm10, %v1536_v53, 0.0  ;;  %v1735_v13 = vmul.f32 %v2801_v25, %v1723_v41 }
 0x916   : > { %v1643_v32 = vmul.f32 %v2744_v50, %v1631_v2  ;;  %v1671_v10 = vmul.f32 %v2797_v17, %v1659_v6  ;;  %v2918_v24 = vadd.f32 %v2253_v0, %v2755_v56  ;;  %v3359_v47 = vand.u32 7, %v2726_v38 }
 0x917   : > { %v3362_v63 = vand.u32 7, %v2764_v60  ;;  %v1598_v2 = vadd.f32 %v1590_v26, %v1570_v8  ;;  %v1599_v42 = vadd.f32 %v1591_v11, %v1571_v54  ;;  %v2941_v53 = vmul.f32 %v2749_v52, %v1345_v29 }
 0x918   : > { %3358 = vst [vmem:[#allocation12_spill] sm:$0xff] %v2918_v24  ;;  %vm2922_vm11 = vcmp.ne.s32.totalorder %v3359_v47, 0  ;;  %v1519_v57 = vmul.f32 %v2740_v48, %v2909_v58  ;;  %v2947_v0 = vmul.f32 %v2740_v48, %v2906_v4  ;;  %v3334_v37 = vrot.slane %v2909_v58, 7 }
 0x919   : > { %vm2928_vm12 = vcmp.ne.s32.totalorder %v3362_v63, 0  ;;  %v1564_v47 = vmul.f32 %v2736_v45, %v1552_v30  ;;  %v3369_v63 = vand.u32 7, %v2767_v61  ;;  %v1651_v29 = vadd.f32 %v1643_v32, %v1598_v2 }
 0x91a   : > { %v2961_v26 = vmul.f32 %v2742_v49, %v2906_v4  ;;  %v1652_v8 = vadd.f32 %v1644_v27, %v1599_v42  ;;  %v3372_v30 = vrot.slane %v2809_v28, 7  ;;  %v3374_v18 = vrot.slane %v2809_v28, 1 }
 0x91b   : > { %vm2954_vm15 = vcmp.ne.s32.totalorder %v3369_v63, 7  ;;  %v1572_v20 = vadd.f32 %v1564_v47, %v1519_v57  ;;  %v3373_v63 = vrot.slane %v2909_v58, 1  ;;  %v1530_v2 = vrot.slane %v2918_v24, 7 }
 0x91c   : > { %v1535_v35 = vsel %vm1531_vm4, %v3372_v30, %v3334_v37  ;;  %v1679_v54 = vadd.f32 %v1671_v10, %v1651_v29  ;;  %v1680_v42 = vadd.f32 %v1672_v31, %v1652_v8  ;;  %v3375_v57 = vand.u32 7, %v2767_v61 }
 0x91d   : > { %v2975_v32 = vsel %vm1612_vm5, %v3374_v18, %v3373_v63  ;;  %v3378_v28 = vand.u32 7, %v2775_v1  ;;  %v3381_v10 = vand.u32 7, %v2764_v60  ;;  %v3002_v29 = vmul.f32 %v2749_v52, %v2906_v4 }
 0x91e   : > { %v1688_v19 = vsel %vm2793_vm9, %v2975_v32, 0.0  ;;  %vm2984_vm1 = vcmp.ne.s32.totalorder %v3375_v57, 0  ;;  %v3004_v61 = vadd.f32 %v1592_v59, %v1572_v20  ;;  %v1724_v30 = vsel %vm2785_vm7, %v1535_v35, 0.0 }
 0x91f   : > { %vm2990_vm3 = vcmp.ne.s32.totalorder %v3378_v28, 0  ;;  %vm2996_vm6 = vcmp.ne.s32.totalorder %v3381_v10, 7  ;;  %3384 = vst [vmem:[#allocation13_spill] sm:$0xff] %v3002_v29  ;;  %v1700_v8 = vmul.f32 %v2799_v22, %v1688_v19  ;;  %v3385_v63 = vand.u32 7, %v2726_v38 }
 0x920   : > { %v1707_v60 = vadd.f32 %v1699_v40, %v1679_v54  ;;  %v1661_v28 = vsel %vm2814_vm10, %v1535_v35, 0.0  ;;  %v1764_v10 = vmul.f32 %v2749_v52, %v2909_v58  ;;  %v3388_v20 = vrot.slane %v2906_v4, 7 }
 0x921   : > { %vm3011_vm0 = vcmp.ne.s32.totalorder %v3385_v63, 7  ;;  %v1708_v14 = vadd.f32 %v1700_v8, %v1680_v42  ;;  %v1736_v59 = vmul.f32 %v2801_v25, %v1724_v30  ;;  %v3389_v63 = vrot.slane %v2779_v9, 7 }
 0x922   : > { %v3023_v19 = vsel %vm1531_vm4, %v3388_v20, %v1530_v2  ;;  %v1611_v54 = vrot.slane %v2918_v24, 1  ;;  %v3031_v37 = vadd.f32 %v1735_v13, %v1707_v60  ;;  %v1787_v27 = vsel %vm2789_vm8, %v2975_v32, 0.0 }
 0x923   : > { %v1539_v40 = vsel %vm1531_vm4, %v1530_v2, %v3389_v63  ;;  %v1744_v8 = vadd.f32 %v1736_v59, %v1708_v14  ;;  %v3390_v21 = vrot.slane %v2906_v4, 1  ;;  %v3391_v13 = vrot.slane %v2779_v9, 1  ;;  %v3066_v9 = vld [vmem:[%s3316_s7 + $0x8] ss:$0 sm:$0xff] }
 0x924   : > { %v1549_v20 = vsel %vm2928_vm12, %v1539_v40, 0.0  ;;  %v1657_v42 = vsel %vm2922_vm11, %v1539_v40, 0.0  ;;  %v1658_v14 = vsel %vm2928_vm12, %v2875_v62, 0.0  ;;  %v1664_v59 = vsel %vm2932_vm13, %v3023_v19, 0.0 }
 0x925   : > { %v1561_v30 = vmul.f32 %v2736_v45, %v1549_v20  ;;  %v3045_v2 = vsel %vm1612_vm5, %v3390_v21, %v1611_v54  ;;  %v3051_v15 = vsel %vm1612_vm5, %v1611_v54, %v3391_v13  ;;  %v1669_v21 = vmul.f32 %v2797_v17, %v1657_v42 }
 0x926   : > { %v1636_v60 = vsel %vm2936_vm14, %v3045_v2, 0.0  ;;  %v1593_v63 = vmul.f32 %v2742_v49, %v2909_v58  ;;  %v3070_v40 = vadd.f32 %v1764_v10, %v1744_v8  ;;  %v1522_v54 = vmul.f32 %v2740_v48, %v2918_v24 }
 0x927   : > { %v1569_v20 = vadd.f32 %v1561_v30, %v2852_v23  ;;  %v3076_v13 = vmul.f32 %v2797_v17, %v1661_v28  ;;  %v3079_v42 = vmul.f32 %v3066_v9, %v1787_v27  ;;  %v1677_v29 = vadd.f32 %v1669_v21, %v2854_v5 }
 0x928   : > { %v1691_v52 = vsel %vm2954_vm15, %v3045_v2, 0.0  ;;  %v3087_v8 = vmul.f32 %v2744_v50, %v1636_v60  ;;  %v1670_v24 = vmul.f32 %v2797_v17, %v1658_v14  ;;  %v3091_v23 = vmul.f32 %v2797_v17, %v1664_v59 }
 0x929   : > { %v1597_v10 = vadd.f32 %v2830_v43, %v1569_v20  ;;  %v3097_v5 = vmul.f32 %v2799_v22, %v1691_v52  ;;  %v1721_v28 = vsel %vm2922_vm11, %v2875_v62, 0.0  ;;  %v1722_v43 = vsel %vm2928_vm12, %v2869_v36, 0.0 }
 0x92a   : > { %3392 = vst [vmem:[#allocation14_spill] sm:$0xff] %v3091_v23  ;;  %v3110_v60 = vadd.f32 %v2755_v56, %v2862_v12  ;;  %v1553_v52 = vsel %vm2990_vm3, %v1535_v35, 0.0  ;;  %v1630_v34 = vsel %vm2996_vm6, %v2893_v46, 0.0  ;;  %v1685_v36 = vsel %vm3011_vm0, %v2893_v46, 0.0 }
 0x92b   : > { %v1565_v62 = vmul.f32 %v2736_v45, %v1553_v52  ;;  %v1642_v7 = vmul.f32 %v2744_v50, %v1630_v34  ;;  %v1686_v56 = vsel %vm2996_vm6, %v2879_v44, 0.0  ;;  %v3393_v12 = vand.u32 7, %v2747_v51  ;;  %v3406_v52 = vld [vmem:[#allocation13_spill] sm:$0xff] }
 0x92c   : > { %v1733_v14 = vmul.f32 %v2801_v25, %v1721_v28  ;;  %v1520_v59 = vmul.f32 %v2740_v48, %v3110_v60  ;;  %v1528_v21 = vrot.slane %v3110_v60, 7  ;;  %v1609_v20 = vrot.slane %v3110_v60, 1 }
 0x92d   : > { %vm3127_vm7 = vcmp.ne.s32.totalorder %v3393_v12, 7  ;;  %v3396_v46 = vand.u32 7, %v2775_v1  ;;  %v1594_v51 = vmul.f32 %v2742_v49, %v3110_v60  ;;  %v1650_v34 = vadd.f32 %v1642_v7, %v1597_v10 }
 0x92e   : > { %v1697_v12 = vmul.f32 %v2799_v22, %v1685_v36  ;;  %v1698_v28 = vmul.f32 %v2799_v22, %v1686_v56  ;;  %v3399_v48 = vrot.slane %v2906_v4, 7  ;;  %v3400_v1 = vrot.slane %v2909_v58, 7 }
 0x92f   : > { %vm3138_vm8 = vcmp.ne.s32.totalorder %v3396_v46, 7  ;;  %v1573_v30 = vadd.f32 %v1565_v62, %v1520_v59  ;;  %v3401_v49 = vrot.slane %v2906_v4, 1  ;;  %v3402_v56 = vrot.slane %v2909_v58, 1 }
 0x930   : > { %v3150_v27 = vsel %vm1531_vm4, %v1528_v21, %v3399_v48  ;;  %v3156_v46 = vsel %vm1531_vm4, %v3400_v1, %v1528_v21  ;;  %v1785_v16 = vsel %vm3011_vm0, %v2879_v44, 0.0  ;;  %v3403_v3 = vsel %vm2984_vm1, %v3023_v19, 0.0 }
 0x931   : > { %v3162_v10 = vsel %vm1612_vm5, %v1609_v20, %v3401_v49  ;;  %v1554_v7 = vsel %vm2984_vm1, %v3156_v46, 0.0  ;;  %v1555_v36 = vsel %vm2932_vm13, %v3150_v27, 0.0  ;;  %v1615_v21 = vsel %vm1612_vm5, %v3402_v56, %v1609_v20 }
 0x932   : > { %v1635_v4 = vsel %vm2954_vm15, %v3162_v10, 0.0  ;;  %v1566_v62 = vmul.f32 %v2736_v45, %v1554_v7  ;;  %v1567_v59 = vmul.f32 %v2736_v45, %v1555_v36  ;;  %v1601_v48 = vadd.f32 %v1593_v63, %v1573_v30 }
 0x933   : > { %v1647_v1 = vmul.f32 %v2744_v50, %v1635_v4  ;;  %v1662_v41 = vsel %vm2990_vm3, %v3156_v46, 0.0  ;;  %v1663_v38 = vsel %vm2984_vm1, %v3150_v27, 0.0  ;;  %v1788_v58 = vsel %vm2793_vm9, %v1615_v21, 0.0 }
 0x934   : > { %v1678_v20 = vadd.f32 %v1670_v24, %v1650_v34  ;;  %v1574_v49 = vadd.f32 %v1566_v62, %v2947_v0  ;;  %v1575_v7 = vadd.f32 %v1567_v59, %v1522_v54  ;;  %v1674_v45 = vmul.f32 %v2797_v17, %v1662_v41 }
 0x935   : > { %v1675_v63 = vmul.f32 %v2797_v17, %v1663_v38  ;;  %v1800_v30 = vmul.f32 %v3066_v9, %v1788_v58  ;;  %v1705_v36 = vadd.f32 %v1697_v12, %v1677_v29  ;;  %v1734_v4 = vmul.f32 %v2801_v25, %v1722_v43  ;;  %v3206_v43 = vld [vmem:[%s3317_s8] ss:$0 sm:$0xff] }
 0x936   : > { %v1706_v56 = vadd.f32 %v1698_v28, %v1678_v20  ;;  %v1602_v23 = vadd.f32 %v1594_v51, %v1574_v49  ;;  %v1786_v24 = vsel %vm2996_vm6, %v2841_v55, 0.0  ;;  %v1771_v0 = vadd.f32 %v2849_v33, %v3031_v37 }
 0x937   : > { %v1741_v54 = vadd.f32 %v1733_v14, %v1705_v36  ;;  %v1797_v34 = vmul.f32 %v3066_v9, %v1785_v16  ;;  %v1798_v29 = vmul.f32 %v3066_v9, %v1786_v24  ;;  %v1808_v31 = vadd.f32 %v1800_v30, %v3070_v40 }
 0x938   : > { %v1742_v17 = vadd.f32 %v1734_v4, %v1706_v56  ;;  %v1655_v57 = vadd.f32 %v1647_v1, %v1602_v23  ;;  %v1807_v44 = vadd.f32 %v3079_v42, %v1771_v0  ;;  %v1633_v55 = vsel %vm3127_vm7, %v2975_v32, 0.0  ;;  %v3404_v0 = vld [vmem:[#allocation11_spill] sm:$0xff] }
 0x939   : > { %v1769_v33 = vadd.f32 %v2941_v53, %v1741_v54  ;;  %v1634_v14 = vsel %vm3138_vm8, %v1615_v21, 0.0  ;;  %v1645_v51 = vmul.f32 %v2744_v50, %v1633_v55  ;;  %v1823_v42 = vadd.f32 %v3206_v43, %v1808_v31 }
 0x93a   : > { %v1770_v37 = vadd.f32 %v2823_v39, %v1742_v17  ;;  %v1683_v12 = vadd.f32 %v1675_v63, %v1655_v57  ;;  %v1822_v23 = vadd.f32 %v3206_v43, %v1807_v44  ;;  %v1646_v40 = vmul.f32 %v2744_v50, %v1634_v14  ;;  %v3408_v44 = vld [vmem:[#allocation14_spill] sm:$0xff] }
 0x93b   : > { %v1805_v28 = vadd.f32 %v1797_v34, %v1769_v33  ;;  %v1653_v32 = vadd.f32 %v1645_v51, %v3004_v61  ;;  %v1689_v53 = vsel %vm3127_vm7, %v1615_v21, 0.0  ;;  %v1831_v59 = vmax.f32 %v1823_v42, 0.0 }
 0x93c   : > { %v1806_v62 = vadd.f32 %v1798_v29, %v1770_v37  ;;  %v1830_v39 = vmax.f32 %v1822_v23, 0.0  ;;  %v1654_v1 = vadd.f32 %v1646_v40, %v1601_v48  ;;  %v1690_v41 = vsel %vm3138_vm8, %v3162_v10, 0.0 }
 0x93d   : > { %v1820_v38 = vadd.f32 %v3206_v43, %v1805_v28  ;;  %v1681_v50 = vadd.f32 %v3076_v13, %v1653_v32  ;;  %v1701_v20 = vmul.f32 %v2799_v22, %v1689_v53  ;;  %v1702_v63 = vmul.f32 %v2799_v22, %v1690_v41 }
 0x93e   : > { %v1821_v58 = vadd.f32 %v3206_v43, %v1806_v62  ;;  %v1837_v49 = vpack.c.bf16 %v1831_v59, %v1830_v39  ;;  %v1682_v61 = vadd.f32 %v1674_v45, %v1654_v1  ;;  %v1725_v21 = vsel %vm2814_vm10, %v3156_v46, 0.0 }
 0x93f   : > { %v1828_v48 = vmax.f32 %v1820_v38, 0.0  ;;  %v1709_v36 = vadd.f32 %v1701_v20, %v1681_v50  ;;  %v1726_v56 = vsel %vm2990_vm3, %v3150_v27, 0.0  ;;  %v1737_v13 = vmul.f32 %v2801_v25, %v1725_v21 }
 0x940   : > { %v1829_v30 = vmax.f32 %v1821_v58, 0.0  ;;  %v1710_v4 = vadd.f32 %v1702_v63, %v1682_v61  ;;  %v1738_v16 = vmul.f32 %v2801_v25, %v1726_v56  ;;  %v1789_v45 = vsel %vm3127_vm7, %v3162_v10, 0.0  ;;  %v3405_v10 = vld [vmem:[#allocation12_spill] sm:$0xff]  ;;  %v3412_v56 = vld [vmem:[#allocation3_spill] sm:$0xff] }
 0x941   : > { %v1739_v46 = vmul.f32 %v2801_v25, %v3403_v3  ;;  %v1790_v18 = vsel %vm3138_vm8, %v3045_v2, 0.0  ;;  %v1603_v27 = vadd.f32 %v2961_v26, %v1575_v7  ;;  %v1765_v54 = vmul.f32 %v3404_v0, %v3110_v60 }
 0x942   : > { %v1836_v24 = vpack.c.bf16 %v1829_v30, %v1828_v48  ;;  %v1745_v17 = vadd.f32 %v1737_v13, %v1709_v36  ;;  %v1746_v34 = vadd.f32 %v1738_v16, %v1710_v4  ;;  %v1711_v35 = vadd.f32 %v3097_v5, %v1683_v12  ;;  %v3410_v48 = vld [vmem:[#allocation4_spill] sm:$0xff]  ;;  %v3414_v13 = vld [vmem:[#allocation5_spill] sm:$0xff] }
 0x943   : > { %v1767_v47 = vmul.f32 %v3404_v0, %v3405_v10  ;;  %v1791_v19 = vsel %vm2954_vm15, %v3051_v15, 0.0  ;;  %v1801_v2 = vmul.f32 %v3066_v9, %v1789_v45  ;;  %v1656_v26 = vadd.f32 %v3087_v8, %v1603_v27  ;;  %v3417_v27 = vld [vmem:[#allocation10_spill] sm:$0xff] }
 0x944   : > { %2262 = vmatprep.mubr.msk.bf16.mxu1 %vm607_vm2, %v1836_v24  ;;  %v1773_v60 = vadd.f32 %v1765_v54, %v1745_v17  ;;  %v1774_v7 = vadd.f32 %v3406_v52, %v1746_v34  ;;  %v1802_v5 = vmul.f32 %v3066_v9, %v1790_v18  ;;  %v1747_v29 = vadd.f32 %v1739_v46, %v1711_v35  ;;  %v3418_v34 = vld [vmem:[#allocation8_spill] sm:$0xff] }
 0x945   : > { %2263 = vmatmul.mubr.msk.bf16.vlgmr.msra.gmra.mrb[24].mxu1 %vm607_vm2, %v1837_v49  ;;  %v3407_v57 = vsel %vm2936_vm14, %v3051_v15, 0.0  ;;  %v1684_v31 = vadd.f32 %v3408_v44, %v1656_v26  ;;  %v1740_v55 = vmul.f32 0.0, %v2801_v25  ;;  %v1803_v14 = vmul.f32 %v3066_v9, %v1791_v19 }
 0x946   : > { %v1704_v11 = vmul.f32 %v2799_v22, %v3407_v57  ;;  %v1809_v33 = vadd.f32 %v1801_v2, %v1773_v60  ;;  %v1810_v8 = vadd.f32 %v1802_v5, %v1774_v7  ;;  %v1775_v37 = vadd.f32 %v1767_v47, %v1747_v29  ;;  %v3420_v47 = vld [vmem:[#allocation7_spill] sm:$0xff]  ;;  %v3422_v2 = vld [vmem:[#allocation9_spill] sm:$0xff] }
 0x947   : > { %v1768_v12 = vmul.f32 0.0, %v3404_v0  ;;  %v1804_v22 = vmul.f32 0.0, %v3066_v9  ;;  %v2077_v9 = vld [vmem:[%s3319_s10] ss:$0 sm:$0xff]  ;;  %vm3411_vm0 = vcmask 261120  }
 0x948   : > { %v1712_v51 = vadd.f32 %v1704_v11, %v1684_v31  ;;  %v1824_v23 = vadd.f32 %v3206_v43, %v1809_v33  ;;  %v1825_v6 = vadd.f32 %v3206_v43, %v1810_v8  ;;  %v1811_v42 = vadd.f32 %v1803_v14, %v1775_v37  ;;  %vm3415_vm4 = vmmov %vm3411_vm0 }
 0x949   : > { %vm3416_vm5 = vmmov %vm3411_vm0 }
 0x94a   : > { %v1748_v15 = vadd.f32 %v1740_v55, %v1712_v51  ;;  %v1832_v40 = vmax.f32 %v1824_v23, 0.0  ;;  %v1833_v28 = vmax.f32 %v1825_v6, 0.0  ;;  %v1826_v62 = vadd.f32 %v3206_v43, %v1811_v42  ;;  %vm3419_vm9 = vmmov %vm3411_vm0 }
 0x94b   : > { %vm3421_vm10 = vmmov %vm3411_vm0 }
 0x94c   : > { %v1776_v25 = vadd.f32 %v1768_v12, %v1748_v15  ;;  %v1838_v32 = vpack.c.bf16 %v1833_v28, %v1832_v40  ;;  %v1834_v59 = vmax.f32 %v1826_v62, 0.0  ;;  %vm3423_vm11 = vmmov %vm3411_vm0 }
 0x94d   : > { %vm3424_vm12 = vmmov %vm3411_vm0 }
 0x94e   : > { %v1812_v53 = vadd.f32 %v1804_v22, %v1776_v25  ;;  %2266 = vmatprep.mubr.msk.bf16.mxu1 %vm607_vm2, %v1838_v32 }
 0x950   : > { %v1827_v39 = vadd.f32 %v3206_v43, %v1812_v53  ;;  %v3409_v43 = vld [vmem:[#allocation6_spill] sm:$0xff] }
 0x952   : > { %v1835_v1 = vmax.f32 %v1827_v39, 0.0 }
 0x954   : > { %v1839_v41 = vpack.c.bf16 %v1835_v1, %v1834_v59 }
 0x956   : > { %2267 = vmatmul.mubr.msk.bf16.gmra.mrb[28].mxu1 %vm607_vm2, %v1839_v41  ;;  %vm3413_vm2 = vmmov %vm3411_vm0 }
 0xa18   : > { %v2264_v38 = vpop.f32.mrb[24].mxu1 }
 0xa19   : > { %v1934_v58 = vadd.f32 %v2264_v38, %v2077_v9  ;;  %v1925_v50 = vpop.f32.mrb[25].mxu1 }
 0xa1a   : > { %v1926_v20 = vadd.f32 %v2077_v9, %v1925_v50  ;;  %v2265_v49 = vpop.f32.mrb[26].mxu1 }
 0xa1b   : > { %v1958_v61 = vadd.f32 %v1934_v58, %v3409_v43  ;;  %v1937_v63 = vadd.f32 %v2265_v49, %v2077_v9  ;;  %v1928_v21 = vpop.f32.mrb[27].mxu1 }
 0xa1c   : > { %v1956_v30 = vadd.f32 %v1926_v20, %v3410_v48  ;;  %v1929_v36 = vadd.f32 %v2077_v9, %v1928_v21 }
 0xa1d   : > { %1966 = vst.msk [vmem:[%s386_s19 + $0x10] sm:$0xff] %vm3411_vm0, %v1958_v61  ;;  %v1959_v4 = vadd.f32 %v1937_v63, %v3412_v56 }
 0xa1e   : > { %1964 = vst.msk [vmem:[%s386_s19] sm:$0xff] %vm3413_vm2, %v1956_v30  ;;  %v1957_v16 = vadd.f32 %v1929_v36, %v3414_v13 }
 0xa1f   : > { %1967 = vst.msk [vmem:[%s386_s19 + $0x18] sm:$0xff] %vm3415_vm4, %v1959_v4 }
 0xa20   : > { %1965 = vst.msk [vmem:[%s386_s19 + $0x8] sm:$0xff] %vm3416_vm5, %v1957_v16 }
 0xa29   : > { %v2268_v45 = vpop.f32.mrb[28].mxu1 }
 0xa2a   : > { %v1950_v3 = vadd.f32 %v2268_v45, %v2077_v9  ;;  %v1941_v46 = vpop.f32.mrb[29].mxu1 }
 0xa2b   : > { %v1942_v24 = vadd.f32 %v2077_v9, %v1941_v46  ;;  %v2269_v18 = vpop.f32.mrb[30].mxu1 }
 0xa2c   : > { %v1962_v0 = vadd.f32 %v1950_v3, %v3417_v27  ;;  %v1953_v54 = vadd.f32 %v2269_v18, %v2077_v9  ;;  %v1944_v17 = vpop.f32.mrb[31].mxu1 }
 0xa2d   : > { %v1960_v35 = vadd.f32 %v1942_v24, %v3418_v34  ;;  %v1945_v10 = vadd.f32 %v2077_v9, %v1944_v17 }
 0xa2e   : > { %1970 = vst.msk [vmem:[%s386_s19 + $0x30] sm:$0xff] %vm3419_vm9, %v1962_v0  ;;  %v1963_v19 = vadd.f32 %v1953_v54, %v3420_v47 }
 0xa2f   : > { %1968 = vst.msk [vmem:[%s386_s19 + $0x20] sm:$0xff] %vm3421_vm10, %v1960_v35  ;;  %v1961_v26 = vadd.f32 %v1945_v10, %v3422_v2 }
 0xa30   : > { %1971 = vst.msk [vmem:[%s386_s19 + $0x38] sm:$0xff] %vm3423_vm11, %v1963_v19 }
 0xa31   : > { %1969 = vst.msk [vmem:[%s386_s19 + $0x28] sm:$0xff] %vm3424_vm12, %v1961_v26 }
 0xa32 PF: > { %s21_s17 = sadd.s32 1, %s2373_s17  }
 0xa33   : > { %p18_p4 = scmp.ge.s32.totalorder %s21_s17, 4  }
 0xa35   :  { %20 = sbr.rel (!%p18_p4) target bundleno = 1 (0x1), region = 94 }

</bundles_post_ra>
